<compile_context>
chip_gen: v7x
topology: tpu7x:2x2x1
jax: 0.10.0
libtpu: 0.0.40
codegen_flags: <defaults>
</compile_context>

<pallas_src>
import jax
import jax.numpy as jnp
from jax.experimental import pallas as pl
from jax.experimental.pallas import tpu as pltpu

LANE = 128


def lstm_kernel(x_ref, wih_ref, whh_ref, b_ref, wlin_ref, blin_ref, out_ref):
    seq_len = x_ref.shape[0]
    Hp = whh_ref.shape[0]          # padded hidden size (multiple of 128)

    # ---- prologue: input projection for ALL timesteps in one matmul ----
    # (seq_len, in) @ (in, 4Hp) + (1, 4Hp)  -> (seq_len, 4Hp)
    x_proj = (jnp.dot(x_ref[...], wih_ref[...],
                      preferred_element_type=jnp.float32) + b_ref[...])

    whh = whh_ref[...]             # (Hp, 4Hp) recurrent weights, kept resident

    # recurrent state carried in registers (no VMEM store/load on the chain)
    h = jnp.zeros((1, Hp), jnp.float32)
    c = jnp.zeros((1, Hp), jnp.float32)

    # short, static sequence -> fully unrolled recurrence (static row slices
    # of x_proj; LLO scheduler sees every step)
    for t in range(seq_len):
        gates = x_proj[t:t + 1, :] + jnp.dot(
            h, whh, preferred_element_type=jnp.float32)        # (1, 4Hp)
        # gate layout is [i | f | o | g]; each block is lane-aligned (Hp=128)
        sig = jax.nn.sigmoid(gates[:, 0:3 * Hp])               # one EUP slab
        i_g = sig[:, 0 * Hp:1 * Hp]
        f_g = sig[:, 1 * Hp:2 * Hp]
        o_g = sig[:, 2 * Hp:3 * Hp]
        g_g = jnp.tanh(gates[:, 3 * Hp:4 * Hp])                # one EUP slab
        c = f_g * c + i_g * g_g
        h = o_g * jnp.tanh(c)

    # final Linear on the last hidden state only (== predictions[-1]);
    # output is lane-padded to 128 -> single unmasked lane-dense store.
    out_ref[...] = (jnp.dot(h, wlin_ref[...],
                            preferred_element_type=jnp.float32) + blin_ref[...])


def lstm_forward(x, wih_t, whh_t, bias, wlin_t, blin, output_size):
    """x: (seq_len, input_size) f32; padded/permuted params -> (output_size,) f32."""
    seq_len, input_size = x.shape
    Hp = whh_t.shape[0]
    out_p = wlin_t.shape[1]        # lane-padded output width (multiple of 128)

    out = pl.pallas_call(
        lstm_kernel,
        out_shape=jax.ShapeDtypeStruct((1, out_p), jnp.float32),
        grid=(1,),
        in_specs=[
            pl.BlockSpec((seq_len, input_size), lambda i: (0, 0)),  # x (full)
            pl.BlockSpec((input_size, 4 * Hp), lambda i: (0, 0)),   # W_ih^T
            pl.BlockSpec((Hp, 4 * Hp), lambda i: (0, 0)),           # W_hh^T
            pl.BlockSpec((1, 4 * Hp), lambda i: (0, 0)),            # b_ih + b_hh
            pl.BlockSpec((Hp, out_p), lambda i: (0, 0)),            # W_lin^T
            pl.BlockSpec((1, out_p), lambda i: (0, 0)),             # b_lin
        ],
        out_specs=pl.BlockSpec((1, out_p), lambda i: (0, 0)),
        compiler_params=pltpu.CompilerParams(
            dimension_semantics=("arbitrary",)),
    )(x, wih_t, whh_t, bias, wlin_t, blin)
    return out[0, :output_size]


def prepare_params(w_ih, w_hh, b_ih, b_hh, w_lin, b_lin, lane=LANE):
    """Pre-transpose, pad H -> Hp and out -> out_p (lane aligned), permute gates.

    Zero padding of the extra rows/columns + zero bias on padded lanes keeps the
    padded h/c lanes mathematically inert (they stay exactly 0 every step), and
    padded output lanes are exactly 0 (sliced away in the wrapper).
    """
    H = w_hh.shape[1]
    out_size = w_lin.shape[0]
    Hp = ((H + lane - 1) // lane) * lane
    out_p = ((out_size + lane - 1) // lane) * lane
    order = (0, 1, 3, 2)               # PyTorch [i, f, g, o] -> kernel [i, f, o, g]

    def gate_blocks(w):                # (4H, X) -> four (H, X) blocks, torch order
        return [w[k * H:(k + 1) * H] for k in range(4)]

    ih = gate_blocks(w_ih)             # each (H, input)
    wih_t = jnp.concatenate(
        [jnp.pad(ih[k].T, ((0, 0), (0, Hp - H))) for k in order], axis=1)

    hh = gate_blocks(w_hh)             # each (H, H)
    whh_t = jnp.concatenate(
        [jnp.pad(hh[k].T, ((0, Hp - H), (0, Hp - H))) for k in order], axis=1)

    b = b_ih + b_hh
    bb = [b[k * H:(k + 1) * H] for k in range(4)]
    bias = jnp.concatenate([jnp.pad(bb[k], (0, Hp - H)) for k in order])[None, :]

    wlin_t = jnp.pad(w_lin.T, ((0, Hp - H), (0, out_p - out_size)))   # (Hp, out_p)
    blin = jnp.pad(b_lin, (0, out_p - out_size))[None, :]             # (1, out_p)
    return wih_t, whh_t, bias, wlin_t, blin


def lstm_reference(x, wih_t, whh_t, bias, wlin_t, blin):
    """Pure-JAX reference (lax.scan), unpadded weights, PyTorch gate order."""
    H = whh_t.shape[0]

    def step(carry, x_t):
        h, c = carry
        gates = x_t[None, :] @ wih_t + h @ whh_t + bias
        i = jax.nn.sigmoid(gates[:, 0 * H:1 * H])
        f = jax.nn.sigmoid(gates[:, 1 * H:2 * H])
        g = jnp.tanh(gates[:, 2 * H:3 * H])
        o = jax.nn.sigmoid(gates[:, 3 * H:4 * H])
        c = f * c + i * g
        h = o * jnp.tanh(c)
        return (h, c), None

    h0 = jnp.zeros((1, H), jnp.float32)
    c0 = jnp.zeros((1, H), jnp.float32)
    (h, _), _ = jax.lax.scan(step, (h0, c0), x)
    return (h @ wlin_t + blin)[0]


if __name__ == "__main__":
    input_size = 2
    hidden = 100
    output_size = 2
    seq_len = 8

    key = jax.random.PRNGKey(0)
    kx, k1, k2, k3, k4, k5, k6 = jax.random.split(key, 7)

    # PyTorch-style uniform(-1/sqrt(H), 1/sqrt(H)) init
    bound = 1.0 / jnp.sqrt(jnp.float32(hidden))
    w_ih = jax.random.uniform(k1, (4 * hidden, input_size), jnp.float32, -bound, bound)
    w_hh = jax.random.uniform(k2, (4 * hidden, hidden), jnp.float32, -bound, bound)
    b_ih = jax.random.uniform(k3, (4 * hidden,), jnp.float32, -bound, bound)
    b_hh = jax.random.uniform(k4, (4 * hidden,), jnp.float32, -bound, bound)
    w_lin = jax.random.uniform(k5, (output_size, hidden), jnp.float32, -bound, bound)
    b_lin = jax.random.uniform(k6, (output_size,), jnp.float32, -bound, bound)

    # input sequence (matches input_seq.view(seq_len, 1, -1) with batch=1)
    x = jax.random.normal(kx, (seq_len, input_size), jnp.float32)

    # lane-padded, gate-permuted parameters for the kernel (plain JAX glue)
    wih_t, whh_t, bias, wlin_t, blin = prepare_params(
        w_ih, w_hh, b_ih, b_hh, w_lin, b_lin)

    out = lstm_forward(x, wih_t, whh_t, bias, wlin_t, blin, output_size)
    out = jax.block_until_ready(out)

    ref = lstm_reference(x, w_ih.T, w_hh.T, (b_ih + b_hh)[None, :],
                         w_lin.T, b_lin[None, :])
    assert out.shape == (output_size,)
    assert jnp.allclose(out, ref, atol=1e-5, rtol=1e-5), (out, ref)

    print("KERNEL_OK")
</pallas_src>

<mosaic_0001>
module attributes {stable_mosaic.version = 11 : i64} {
  func.func @lstm_kernel(%arg0: i32, %arg1: memref<8x2xf32, #tpu.memory_space<vmem>>, %arg2: memref<2x512xf32, #tpu.memory_space<vmem>>, %arg3: memref<128x512xf32, #tpu.memory_space<vmem>>, %arg4: memref<1x512xf32, #tpu.memory_space<vmem>>, %arg5: memref<128x128xf32, #tpu.memory_space<vmem>>, %arg6: memref<1x128xf32, #tpu.memory_space<vmem>>, %arg7: memref<1x128xf32, #tpu.memory_space<vmem>>) attributes {dimension_semantics = [#tpu.dimension_semantics<arbitrary>], iteration_bounds = array<i64: 1>, scalar_prefetch = 0 : i64, scratch_operands = 0 : i64, tpu.core_type = #tpu.core_type<tc>, window_params = [{pipeline_mode = #tpu.pipeline_mode<synchronous>, transform_indices = @transform_0, window_bounds = array<i64: 8, 2>}, {pipeline_mode = #tpu.pipeline_mode<synchronous>, transform_indices = @transform_1, window_bounds = array<i64: 2, 512>}, {pipeline_mode = #tpu.pipeline_mode<synchronous>, transform_indices = @transform_2, window_bounds = array<i64: 128, 512>}, {pipeline_mode = #tpu.pipeline_mode<synchronous>, transform_indices = @transform_3, window_bounds = array<i64: 1, 512>}, {pipeline_mode = #tpu.pipeline_mode<synchronous>, transform_indices = @transform_4, window_bounds = array<i64: 128, 128>}, {pipeline_mode = #tpu.pipeline_mode<synchronous>, transform_indices = @transform_5, window_bounds = array<i64: 1, 128>}, {pipeline_mode = #tpu.pipeline_mode<synchronous>, transform_indices = @transform_6, window_bounds = array<i64: 1, 128>}]} {
    %c0 = arith.constant 0 : index
    %c0_0 = arith.constant 0 : index
    %0 = vector.load %arg1[%c0, %c0_0] : memref<8x2xf32, #tpu.memory_space<vmem>>, vector<8x2xf32>
    %c0_1 = arith.constant 0 : index
    %c0_2 = arith.constant 0 : index
    %1 = vector.load %arg2[%c0_1, %c0_2] : memref<2x512xf32, #tpu.memory_space<vmem>>, vector<2x512xf32>
    %cst = arith.constant dense<0.000000e+00> : vector<8x512xf32>
    %2 = tpu.matmul %0, %1, %cst {dimension_numbers = #tpu.dot_dimension_numbers<[1], [0], [0], [1], [0, 0, 1, 1], [], []>} : vector<8x2xf32>, vector<2x512xf32>, vector<8x512xf32> -> vector<8x512xf32>
    %c0_3 = arith.constant 0 : index
    %c0_4 = arith.constant 0 : index
    %3 = vector.load %arg4[%c0_3, %c0_4] : memref<1x512xf32, #tpu.memory_space<vmem>>, vector<1x512xf32>
    %4 = vector.broadcast %3 : vector<1x512xf32> to vector<8x512xf32>
    %5 = arith.addf %2, %4 : vector<8x512xf32>
    %c0_5 = arith.constant 0 : index
    %c0_6 = arith.constant 0 : index
    %6 = vector.load %arg3[%c0_5, %c0_6] : memref<128x512xf32, #tpu.memory_space<vmem>>, vector<128x512xf32>
    %cst_7 = arith.constant 0.000000e+00 : f32
    %7 = vector.broadcast %cst_7 : f32 to vector<1x128xf32>
    %cst_8 = arith.constant 0.000000e+00 : f32
    %8 = vector.broadcast %cst_8 : f32 to vector<1x128xf32>
    %9 = vector.extract_strided_slice %5 {offsets = [0, 0], sizes = [1, 512], strides = [1, 1]} : vector<8x512xf32> to vector<1x512xf32>
    %cst_9 = arith.constant dense<0.000000e+00> : vector<1x512xf32>
    %10 = tpu.matmul %7, %6, %cst_9 {dimension_numbers = #tpu.dot_dimension_numbers<[1], [0], [0], [1], [0, 0, 1, 1], [], []>} : vector<1x128xf32>, vector<128x512xf32>, vector<1x512xf32> -> vector<1x512xf32>
    %11 = arith.addf %9, %10 : vector<1x512xf32>
    %12 = vector.extract_strided_slice %11 {offsets = [0, 0], sizes = [1, 384], strides = [1, 1]} : vector<1x512xf32> to vector<1x384xf32>
    %13 = arith.negf %12 : vector<1x384xf32>
    %14 = math.exp %13 : vector<1x384xf32>
    %cst_10 = arith.constant 1.000000e+00 : f32
    %15 = vector.broadcast %cst_10 : f32 to vector<1x384xf32>
    %16 = arith.addf %15, %14 : vector<1x384xf32>
    %17 = arith.divf %15, %16 : vector<1x384xf32>
    %18 = vector.extract_strided_slice %17 {offsets = [0, 0], sizes = [1, 128], strides = [1, 1]} : vector<1x384xf32> to vector<1x128xf32>
    %19 = vector.extract_strided_slice %17 {offsets = [0, 128], sizes = [1, 128], strides = [1, 1]} : vector<1x384xf32> to vector<1x128xf32>
    %20 = vector.extract_strided_slice %17 {offsets = [0, 256], sizes = [1, 128], strides = [1, 1]} : vector<1x384xf32> to vector<1x128xf32>
    %21 = vector.extract_strided_slice %11 {offsets = [0, 384], sizes = [1, 128], strides = [1, 1]} : vector<1x512xf32> to vector<1x128xf32>
    %22 = math.tanh %21 : vector<1x128xf32>
    %23 = arith.mulf %19, %8 : vector<1x128xf32>
    %24 = arith.mulf %18, %22 : vector<1x128xf32>
    %25 = arith.addf %23, %24 : vector<1x128xf32>
    %26 = math.tanh %25 : vector<1x128xf32>
    %27 = arith.mulf %20, %26 : vector<1x128xf32>
    %28 = vector.extract_strided_slice %5 {offsets = [1, 0], sizes = [1, 512], strides = [1, 1]} : vector<8x512xf32> to vector<1x512xf32>
    %cst_11 = arith.constant dense<0.000000e+00> : vector<1x512xf32>
    %29 = tpu.matmul %27, %6, %cst_11 {dimension_numbers = #tpu.dot_dimension_numbers<[1], [0], [0], [1], [0, 0, 1, 1], [], []>} : vector<1x128xf32>, vector<128x512xf32>, vector<1x512xf32> -> vector<1x512xf32>
    %30 = arith.addf %28, %29 : vector<1x512xf32>
    %31 = vector.extract_strided_slice %30 {offsets = [0, 0], sizes = [1, 384], strides = [1, 1]} : vector<1x512xf32> to vector<1x384xf32>
    %32 = arith.negf %31 : vector<1x384xf32>
    %33 = math.exp %32 : vector<1x384xf32>
    %cst_12 = arith.constant 1.000000e+00 : f32
    %34 = vector.broadcast %cst_12 : f32 to vector<1x384xf32>
    %35 = arith.addf %34, %33 : vector<1x384xf32>
    %36 = arith.divf %34, %35 : vector<1x384xf32>
    %37 = vector.extract_strided_slice %36 {offsets = [0, 0], sizes = [1, 128], strides = [1, 1]} : vector<1x384xf32> to vector<1x128xf32>
    %38 = vector.extract_strided_slice %36 {offsets = [0, 128], sizes = [1, 128], strides = [1, 1]} : vector<1x384xf32> to vector<1x128xf32>
    %39 = vector.extract_strided_slice %36 {offsets = [0, 256], sizes = [1, 128], strides = [1, 1]} : vector<1x384xf32> to vector<1x128xf32>
    %40 = vector.extract_strided_slice %30 {offsets = [0, 384], sizes = [1, 128], strides = [1, 1]} : vector<1x512xf32> to vector<1x128xf32>
    %41 = math.tanh %40 : vector<1x128xf32>
    %42 = arith.mulf %38, %25 : vector<1x128xf32>
    %43 = arith.mulf %37, %41 : vector<1x128xf32>
    %44 = arith.addf %42, %43 : vector<1x128xf32>
    %45 = math.tanh %44 : vector<1x128xf32>
    %46 = arith.mulf %39, %45 : vector<1x128xf32>
    %47 = vector.extract_strided_slice %5 {offsets = [2, 0], sizes = [1, 512], strides = [1, 1]} : vector<8x512xf32> to vector<1x512xf32>
    %cst_13 = arith.constant dense<0.000000e+00> : vector<1x512xf32>
    %48 = tpu.matmul %46, %6, %cst_13 {dimension_numbers = #tpu.dot_dimension_numbers<[1], [0], [0], [1], [0, 0, 1, 1], [], []>} : vector<1x128xf32>, vector<128x512xf32>, vector<1x512xf32> -> vector<1x512xf32>
    %49 = arith.addf %47, %48 : vector<1x512xf32>
    %50 = vector.extract_strided_slice %49 {offsets = [0, 0], sizes = [1, 384], strides = [1, 1]} : vector<1x512xf32> to vector<1x384xf32>
    %51 = arith.negf %50 : vector<1x384xf32>
    %52 = math.exp %51 : vector<1x384xf32>
    %cst_14 = arith.constant 1.000000e+00 : f32
    %53 = vector.broadcast %cst_14 : f32 to vector<1x384xf32>
    %54 = arith.addf %53, %52 : vector<1x384xf32>
    %55 = arith.divf %53, %54 : vector<1x384xf32>
    %56 = vector.extract_strided_slice %55 {offsets = [0, 0], sizes = [1, 128], strides = [1, 1]} : vector<1x384xf32> to vector<1x128xf32>
    %57 = vector.extract_strided_slice %55 {offsets = [0, 128], sizes = [1, 128], strides = [1, 1]} : vector<1x384xf32> to vector<1x128xf32>
    %58 = vector.extract_strided_slice %55 {offsets = [0, 256], sizes = [1, 128], strides = [1, 1]} : vector<1x384xf32> to vector<1x128xf32>
    %59 = vector.extract_strided_slice %49 {offsets = [0, 384], sizes = [1, 128], strides = [1, 1]} : vector<1x512xf32> to vector<1x128xf32>
    %60 = math.tanh %59 : vector<1x128xf32>
    %61 = arith.mulf %57, %44 : vector<1x128xf32>
    %62 = arith.mulf %56, %60 : vector<1x128xf32>
    %63 = arith.addf %61, %62 : vector<1x128xf32>
    %64 = math.tanh %63 : vector<1x128xf32>
    %65 = arith.mulf %58, %64 : vector<1x128xf32>
    %66 = vector.extract_strided_slice %5 {offsets = [3, 0], sizes = [1, 512], strides = [1, 1]} : vector<8x512xf32> to vector<1x512xf32>
    %cst_15 = arith.constant dense<0.000000e+00> : vector<1x512xf32>
    %67 = tpu.matmul %65, %6, %cst_15 {dimension_numbers = #tpu.dot_dimension_numbers<[1], [0], [0], [1], [0, 0, 1, 1], [], []>} : vector<1x128xf32>, vector<128x512xf32>, vector<1x512xf32> -> vector<1x512xf32>
    %68 = arith.addf %66, %67 : vector<1x512xf32>
    %69 = vector.extract_strided_slice %68 {offsets = [0, 0], sizes = [1, 384], strides = [1, 1]} : vector<1x512xf32> to vector<1x384xf32>
    %70 = arith.negf %69 : vector<1x384xf32>
    %71 = math.exp %70 : vector<1x384xf32>
    %cst_16 = arith.constant 1.000000e+00 : f32
    %72 = vector.broadcast %cst_16 : f32 to vector<1x384xf32>
    %73 = arith.addf %72, %71 : vector<1x384xf32>
    %74 = arith.divf %72, %73 : vector<1x384xf32>
    %75 = vector.extract_strided_slice %74 {offsets = [0, 0], sizes = [1, 128], strides = [1, 1]} : vector<1x384xf32> to vector<1x128xf32>
    %76 = vector.extract_strided_slice %74 {offsets = [0, 128], sizes = [1, 128], strides = [1, 1]} : vector<1x384xf32> to vector<1x128xf32>
    %77 = vector.extract_strided_slice %74 {offsets = [0, 256], sizes = [1, 128], strides = [1, 1]} : vector<1x384xf32> to vector<1x128xf32>
    %78 = vector.extract_strided_slice %68 {offsets = [0, 384], sizes = [1, 128], strides = [1, 1]} : vector<1x512xf32> to vector<1x128xf32>
    %79 = math.tanh %78 : vector<1x128xf32>
    %80 = arith.mulf %76, %63 : vector<1x128xf32>
    %81 = arith.mulf %75, %79 : vector<1x128xf32>
    %82 = arith.addf %80, %81 : vector<1x128xf32>
    %83 = math.tanh %82 : vector<1x128xf32>
    %84 = arith.mulf %77, %83 : vector<1x128xf32>
    %85 = vector.extract_strided_slice %5 {offsets = [4, 0], sizes = [1, 512], strides = [1, 1]} : vector<8x512xf32> to vector<1x512xf32>
    %cst_17 = arith.constant dense<0.000000e+00> : vector<1x512xf32>
    %86 = tpu.matmul %84, %6, %cst_17 {dimension_numbers = #tpu.dot_dimension_numbers<[1], [0], [0], [1], [0, 0, 1, 1], [], []>} : vector<1x128xf32>, vector<128x512xf32>, vector<1x512xf32> -> vector<1x512xf32>
    %87 = arith.addf %85, %86 : vector<1x512xf32>
    %88 = vector.extract_strided_slice %87 {offsets = [0, 0], sizes = [1, 384], strides = [1, 1]} : vector<1x512xf32> to vector<1x384xf32>
    %89 = arith.negf %88 : vector<1x384xf32>
    %90 = math.exp %89 : vector<1x384xf32>
    %cst_18 = arith.constant 1.000000e+00 : f32
    %91 = vector.broadcast %cst_18 : f32 to vector<1x384xf32>
    %92 = arith.addf %91, %90 : vector<1x384xf32>
    %93 = arith.divf %91, %92 : vector<1x384xf32>
    %94 = vector.extract_strided_slice %93 {offsets = [0, 0], sizes = [1, 128], strides = [1, 1]} : vector<1x384xf32> to vector<1x128xf32>
    %95 = vector.extract_strided_slice %93 {offsets = [0, 128], sizes = [1, 128], strides = [1, 1]} : vector<1x384xf32> to vector<1x128xf32>
    %96 = vector.extract_strided_slice %93 {offsets = [0, 256], sizes = [1, 128], strides = [1, 1]} : vector<1x384xf32> to vector<1x128xf32>
    %97 = vector.extract_strided_slice %87 {offsets = [0, 384], sizes = [1, 128], strides = [1, 1]} : vector<1x512xf32> to vector<1x128xf32>
    %98 = math.tanh %97 : vector<1x128xf32>
    %99 = arith.mulf %95, %82 : vector<1x128xf32>
    %100 = arith.mulf %94, %98 : vector<1x128xf32>
    %101 = arith.addf %99, %100 : vector<1x128xf32>
    %102 = math.tanh %101 : vector<1x128xf32>
    %103 = arith.mulf %96, %102 : vector<1x128xf32>
    %104 = vector.extract_strided_slice %5 {offsets = [5, 0], sizes = [1, 512], strides = [1, 1]} : vector<8x512xf32> to vector<1x512xf32>
    %cst_19 = arith.constant dense<0.000000e+00> : vector<1x512xf32>
    %105 = tpu.matmul %103, %6, %cst_19 {dimension_numbers = #tpu.dot_dimension_numbers<[1], [0], [0], [1], [0, 0, 1, 1], [], []>} : vector<1x128xf32>, vector<128x512xf32>, vector<1x512xf32> -> vector<1x512xf32>
    %106 = arith.addf %104, %105 : vector<1x512xf32>
    %107 = vector.extract_strided_slice %106 {offsets = [0, 0], sizes = [1, 384], strides = [1, 1]} : vector<1x512xf32> to vector<1x384xf32>
    %108 = arith.negf %107 : vector<1x384xf32>
    %109 = math.exp %108 : vector<1x384xf32>
    %cst_20 = arith.constant 1.000000e+00 : f32
    %110 = vector.broadcast %cst_20 : f32 to vector<1x384xf32>
    %111 = arith.addf %110, %109 : vector<1x384xf32>
    %112 = arith.divf %110, %111 : vector<1x384xf32>
    %113 = vector.extract_strided_slice %112 {offsets = [0, 0], sizes = [1, 128], strides = [1, 1]} : vector<1x384xf32> to vector<1x128xf32>
    %114 = vector.extract_strided_slice %112 {offsets = [0, 128], sizes = [1, 128], strides = [1, 1]} : vector<1x384xf32> to vector<1x128xf32>
    %115 = vector.extract_strided_slice %112 {offsets = [0, 256], sizes = [1, 128], strides = [1, 1]} : vector<1x384xf32> to vector<1x128xf32>
    %116 = vector.extract_strided_slice %106 {offsets = [0, 384], sizes = [1, 128], strides = [1, 1]} : vector<1x512xf32> to vector<1x128xf32>
    %117 = math.tanh %116 : vector<1x128xf32>
    %118 = arith.mulf %114, %101 : vector<1x128xf32>
    %119 = arith.mulf %113, %117 : vector<1x128xf32>
    %120 = arith.addf %118, %119 : vector<1x128xf32>
    %121 = math.tanh %120 : vector<1x128xf32>
    %122 = arith.mulf %115, %121 : vector<1x128xf32>
    %123 = vector.extract_strided_slice %5 {offsets = [6, 0], sizes = [1, 512], strides = [1, 1]} : vector<8x512xf32> to vector<1x512xf32>
    %cst_21 = arith.constant dense<0.000000e+00> : vector<1x512xf32>
    %124 = tpu.matmul %122, %6, %cst_21 {dimension_numbers = #tpu.dot_dimension_numbers<[1], [0], [0], [1], [0, 0, 1, 1], [], []>} : vector<1x128xf32>, vector<128x512xf32>, vector<1x512xf32> -> vector<1x512xf32>
    %125 = arith.addf %123, %124 : vector<1x512xf32>
    %126 = vector.extract_strided_slice %125 {offsets = [0, 0], sizes = [1, 384], strides = [1, 1]} : vector<1x512xf32> to vector<1x384xf32>
    %127 = arith.negf %126 : vector<1x384xf32>
    %128 = math.exp %127 : vector<1x384xf32>
    %cst_22 = arith.constant 1.000000e+00 : f32
    %129 = vector.broadcast %cst_22 : f32 to vector<1x384xf32>
    %130 = arith.addf %129, %128 : vector<1x384xf32>
    %131 = arith.divf %129, %130 : vector<1x384xf32>
    %132 = vector.extract_strided_slice %131 {offsets = [0, 0], sizes = [1, 128], strides = [1, 1]} : vector<1x384xf32> to vector<1x128xf32>
    %133 = vector.extract_strided_slice %131 {offsets = [0, 128], sizes = [1, 128], strides = [1, 1]} : vector<1x384xf32> to vector<1x128xf32>
    %134 = vector.extract_strided_slice %131 {offsets = [0, 256], sizes = [1, 128], strides = [1, 1]} : vector<1x384xf32> to vector<1x128xf32>
    %135 = vector.extract_strided_slice %125 {offsets = [0, 384], sizes = [1, 128], strides = [1, 1]} : vector<1x512xf32> to vector<1x128xf32>
    %136 = math.tanh %135 : vector<1x128xf32>
    %137 = arith.mulf %133, %120 : vector<1x128xf32>
    %138 = arith.mulf %132, %136 : vector<1x128xf32>
    %139 = arith.addf %137, %138 : vector<1x128xf32>
    %140 = math.tanh %139 : vector<1x128xf32>
    %141 = arith.mulf %134, %140 : vector<1x128xf32>
    %142 = vector.extract_strided_slice %5 {offsets = [7, 0], sizes = [1, 512], strides = [1, 1]} : vector<8x512xf32> to vector<1x512xf32>
    %cst_23 = arith.constant dense<0.000000e+00> : vector<1x512xf32>
    %143 = tpu.matmul %141, %6, %cst_23 {dimension_numbers = #tpu.dot_dimension_numbers<[1], [0], [0], [1], [0, 0, 1, 1], [], []>} : vector<1x128xf32>, vector<128x512xf32>, vector<1x512xf32> -> vector<1x512xf32>
    %144 = arith.addf %142, %143 : vector<1x512xf32>
    %145 = vector.extract_strided_slice %144 {offsets = [0, 0], sizes = [1, 384], strides = [1, 1]} : vector<1x512xf32> to vector<1x384xf32>
    %146 = arith.negf %145 : vector<1x384xf32>
    %147 = math.exp %146 : vector<1x384xf32>
    %cst_24 = arith.constant 1.000000e+00 : f32
    %148 = vector.broadcast %cst_24 : f32 to vector<1x384xf32>
    %149 = arith.addf %148, %147 : vector<1x384xf32>
    %150 = arith.divf %148, %149 : vector<1x384xf32>
    %151 = vector.extract_strided_slice %150 {offsets = [0, 0], sizes = [1, 128], strides = [1, 1]} : vector<1x384xf32> to vector<1x128xf32>
    %152 = vector.extract_strided_slice %150 {offsets = [0, 128], sizes = [1, 128], strides = [1, 1]} : vector<1x384xf32> to vector<1x128xf32>
    %153 = vector.extract_strided_slice %150 {offsets = [0, 256], sizes = [1, 128], strides = [1, 1]} : vector<1x384xf32> to vector<1x128xf32>
    %154 = vector.extract_strided_slice %144 {offsets = [0, 384], sizes = [1, 128], strides = [1, 1]} : vector<1x512xf32> to vector<1x128xf32>
    %155 = math.tanh %154 : vector<1x128xf32>
    %156 = arith.mulf %152, %139 : vector<1x128xf32>
    %157 = arith.mulf %151, %155 : vector<1x128xf32>
    %158 = arith.addf %156, %157 : vector<1x128xf32>
    %159 = math.tanh %158 : vector<1x128xf32>
    %160 = arith.mulf %153, %159 : vector<1x128xf32>
    %c0_25 = arith.constant 0 : index
    %c0_26 = arith.constant 0 : index
    %161 = vector.load %arg5[%c0_25, %c0_26] : memref<128x128xf32, #tpu.memory_space<vmem>>, vector<128x128xf32>
    %cst_27 = arith.constant dense<0.000000e+00> : vector<1x128xf32>
    %162 = tpu.matmul %160, %161, %cst_27 {dimension_numbers = #tpu.dot_dimension_numbers<[1], [0], [0], [1], [0, 0, 1, 1], [], []>} : vector<1x128xf32>, vector<128x128xf32>, vector<1x128xf32> -> vector<1x128xf32>
    %c0_28 = arith.constant 0 : index
    %c0_29 = arith.constant 0 : index
    %163 = vector.load %arg6[%c0_28, %c0_29] : memref<1x128xf32, #tpu.memory_space<vmem>>, vector<1x128xf32>
    %164 = arith.addf %162, %163 : vector<1x128xf32>
    %c0_30 = arith.constant 0 : index
    %c0_31 = arith.constant 0 : index
    %165 = vector.load %arg7[%c0_30, %c0_31] : memref<1x128xf32, #tpu.memory_space<vmem>>, vector<1x128xf32>
    tpu.vector_store %arg7[%c0_30, %c0_31], %164 {strides = array<i32>} : memref<1x128xf32, #tpu.memory_space<vmem>>, vector<1x128xf32>,
    return
  }
  func.func @transform_0(%arg0: i32) -> (i32, i32) {
    %c0_i32 = arith.constant 0 : i32
    %c0_i32_0 = arith.constant 0 : i32
    %c0_i32_1 = arith.constant 0 : i32
    return %c0_i32, %c0_i32_0 : i32, i32
  }
  func.func @transform_1(%arg0: i32) -> (i32, i32) {
    %c0_i32 = arith.constant 0 : i32
    %c0_i32_0 = arith.constant 0 : i32
    %c0_i32_1 = arith.constant 0 : i32
    return %c0_i32, %c0_i32_0 : i32, i32
  }
  func.func @transform_2(%arg0: i32) -> (i32, i32) {
    %c0_i32 = arith.constant 0 : i32
    %c0_i32_0 = arith.constant 0 : i32
    %c0_i32_1 = arith.constant 0 : i32
    return %c0_i32, %c0_i32_0 : i32, i32
  }
  func.func @transform_3(%arg0: i32) -> (i32, i32) {
    %c0_i32 = arith.constant 0 : i32
    %c0_i32_0 = arith.constant 0 : i32
    %c0_i32_1 = arith.constant 0 : i32
    return %c0_i32, %c0_i32_0 : i32, i32
  }
  func.func @transform_4(%arg0: i32) -> (i32, i32) {
    %c0_i32 = arith.constant 0 : i32
    %c0_i32_0 = arith.constant 0 : i32
    %c0_i32_1 = arith.constant 0 : i32
    return %c0_i32, %c0_i32_0 : i32, i32
  }
  func.func @transform_5(%arg0: i32) -> (i32, i32) {
    %c0_i32 = arith.constant 0 : i32
    %c0_i32_0 = arith.constant 0 : i32
    %c0_i32_1 = arith.constant 0 : i32
    return %c0_i32, %c0_i32_0 : i32, i32
  }
  func.func @transform_6(%arg0: i32) -> (i32, i32) {
    %c0_i32 = arith.constant 0 : i32
    %c0_i32_0 = arith.constant 0 : i32
    %c0_i32_1 = arith.constant 0 : i32
    return %c0_i32, %c0_i32_0 : i32, i32
  }
}

</mosaic_0001>

<bundles_post_ra>
// kernel: tpu_custom_call.1
= control target key start
LH: loop header
LB: loop body
LE: loop exit
PB: predicated region body
PF: predicated region fallthrough
CT: control target
= control target key end

     0   :  { %11 = vsyncpa [#allocation3], 0  ;;  %s3249_s0 = inlined_call_operand.vmem [shape: f32[8,2], index: 0, kind: input, shape index: {}]   ;;  %s3250_s1 = inlined_call_operand.vmem [shape: f32[2,512], index: 1, kind: input, shape index: {}]   ;;  %s3251_s2 = inlined_call_operand.hbm [shape: f32[128,512], index: 2, kind: input, shape index: {}]   ;;  %s3252_s3 = inlined_call_operand.vmem [shape: f32[1,512], index: 3, kind: input, shape index: {}]   ;;  %s3253_s4 = inlined_call_operand.hbm [shape: f32[128,128], index: 4, kind: input, shape index: {}]   ;;  %s3254_s5 = inlined_call_operand.vmem [shape: f32[1,128], index: 5, kind: input, shape index: {}]   ;;  %s3255_s6 = inlined_call_operand.hbm [shape: f32[1,128], index: 6, kind: output, shape index: {}]  }
   0x1   :  { %12 = vsyncpa [#allocation6], 0 }
   0x2   :  { %13 = vsyncpa [#allocation4], 0  ;;  %s2733_s21 = smov [#allocation2]   ;;  %s2661_s25 = scalar_lea.hbm %s3251_s2, 8192 }
   0x3   :  { %s23_s22 = sshll.u32 %s2733_s21, 4  ;;  %p2662_p0 = scmp.ne.s32.totalorder %s3251_s2, %s2661_s25  ;;  %s24_s22 = int_to_ptr.vmem [resolvable:$true] %s23_s22 }
   0x4   :  { %p2665_p1 = scmp.lt.u32.totalorder %s2661_s25, %s3251_s2 }
   0x6   :  { %p2667_p2 = pnand %p2665_p1, %p2662_p0 }
   0x8   :  { %2670 = shalt.err (!%p2667_p2)
}
   0x9   :  { %s2671_s30 = scalar_lea.vmem %s24_s22, 8192  ;;  %p2676_p4 = scmp.lt.s32.totalorder %s24_s22, %s24_s22 }
   0xa   :  { %p2672_p3 = scmp.ne.s32.totalorder %s24_s22, %s2671_s30  ;;  %p2677_p5 = scmp.lt.s32.totalorder %s2671_s30, %s2671_s30 }
   0xc   :  { %p2678_p6 = por %p2677_p5, %p2676_p4 }
   0xe   :  { %p2679_p7 = pnand %p2678_p6, %p2672_p3 }
  0x10   :  { %2682 = shalt.err (!%p2679_p7)
}
  0x11   :  { %s2734_s7 = smov 512   ;;  %s2735_s8 = smov 32  }
  0x12   :  { %29 = dma.hbm_to_vmem [thread:$0]  %s3251_s2, 8192, %s24_s22, [#allocation3], %s2734_s7, %s2734_s7, %s2735_s8  }
  0x13   :  { %s2736_s11 = smov [#allocation5]   ;;  %s2683_s15 = scalar_lea.hbm %s3253_s4, 2048 }
  0x14   :  { %s37_s12 = sshll.u32 %s2736_s11, 4  ;;  %p2684_p8 = scmp.ne.s32.totalorder %s3253_s4, %s2683_s15  ;;  %s38_s12 = int_to_ptr.vmem [resolvable:$true] %s37_s12 }
  0x15   :  { %p2687_p9 = scmp.lt.u32.totalorder %s2683_s15, %s3253_s4 }
  0x17   :  { %p2689_p10 = pnand %p2687_p9, %p2684_p8 }
  0x19   :  { %2692 = shalt.err (!%p2689_p10)
}
  0x1a   :  { %s2693_s20 = scalar_lea.vmem %s38_s12, 2048  ;;  %p2698_p12 = scmp.lt.s32.totalorder %s38_s12, %s38_s12 }
  0x1b   :  { %p2694_p11 = scmp.ne.s32.totalorder %s38_s12, %s2693_s20  ;;  %p2699_p13 = scmp.lt.s32.totalorder %s2693_s20, %s2693_s20 }
  0x1d   :  { %p2700_p0 = por %p2699_p13, %p2698_p12 }
  0x1f   :  { %p2701_p1 = pnand %p2700_p0, %p2694_p11 }
  0x21   :  { %2704 = shalt.err (!%p2701_p1)
}
  0x22   :  { %s2737_s2 = smov 128   ;;  %s2738_s21 = smov 8  }
  0x23   :  { %43 = dma.hbm_to_vmem [thread:$0]  %s3253_s4, 2048, %s38_s12, [#allocation6], %s2737_s2, %s2737_s2, %s2738_s21  }
  0x24   :  { %2727 = dma.done.wait [#allocation3], 8192  }
  0x25   :  { %2728 = vsyncadd [#allocation3], 4294959104 }
  0x26   :  { %2729 = dma.done.wait [#allocation6], 2048  }
  0x27   :  { %2730 = vsyncadd [#allocation6], 4294965248  ;;  %v56_v0 = vlaneseq  ;;  %v2739_v1 = vmov 1983009808   ;;  %v2740_v3 = vmov 0.0   ;;  %v250_v7 = vld [vmem:[#allocation2 + $0x8] sm:$0xff] }
  0x28   :  { %v79_v2 = vunpack.c.l.s4 %v2739_v1  ;;  %171 = vmatprep.mubr.f32.mxu1 %v2740_v3  ;;  %377 = vmatprep.mubr.f32.mxu0 %v2740_v3  ;;  %v254_v8 = vld [vmem:[#allocation2 + $0x28] sm:$0xff]  ;;  %v249_v9 = vld [vmem:[#allocation2] sm:$0xff]  ;;  %v53_v12 = vld [vmem:[%s3250_s1] sm:$0xff]  ;;  %vm98_vm0 = vcmask 1041408   ;;  %vm94_vm1 = vcmask 15360   ;;  %vm2742_vm2 = vmmov 0  }
  0x29   :  { %v2805_v4 = vshrl.u32 %v56_v0, 7  ;;  %v2808_v10 = vpack.c.bf16 %v254_v8, %v250_v7  ;;  %v253_v11 = vld [vmem:[#allocation2 + $0x20] sm:$0xff]  ;;  %v77_v14 = vcombine.high %v53_v12, %v53_v12  ;;  %v258_v16 = vld [vmem:[#allocation2 + $0x48] sm:$0xff]  ;;  %v252_v21 = vld [vmem:[#allocation2 + $0x18] sm:$0xff]  ;;  %s2743_s28 = smov [#allocation7]  }
  0x2a   :  { %v80_v5 = vunpack.c.0.s8 %v79_v2  ;;  %v2813_v13 = vpack.c.bf16 %v253_v11, %v249_v9  ;;  %v262_v17 = vld [vmem:[#allocation2 + $0x68] sm:$0xff]  ;;  %v257_v18 = vld [vmem:[#allocation2 + $0x40] sm:$0xff]  ;;  %v256_v22 = vld [vmem:[#allocation2 + $0x38] sm:$0xff]  ;;  %s1893_s29 = sshll.u32 %s2743_s28, 4  ;;  %s1894_s29 = int_to_ptr.vmem [resolvable:$true] %s1893_s29 }
  0x2b   :  { %1986 = vmatprep.subr.bf16.mxu0 %v2808_v10  ;;  %v2816_v19 = vpack.c.bf16 %v262_v17, %v258_v16  ;;  %v261_v20 = vld [vmem:[#allocation2 + $0x60] sm:$0xff]  ;;  %v266_v25 = vld [vmem:[#allocation2 + $0x88] sm:$0xff]  ;;  %v52_v27 = vld [vmem:[%s3249_s0] sm:$0xff]  ;;  %v2826_v32 = vpack.c.bf16 %v256_v22, %v252_v21  ;;  %s2705_s30 = scalar_lea.vmem %s1894_s29, 16  ;;  %s2709_s7 = scalar_lea.vmem %s1894_s29, 32 }
  0x2c   :  { %v83_v6 = vsub.s32 %v80_v5, %v2805_v4  ;;  %1988 = vmatpush1.bf16.msra.mxu0 %v2813_v13  ;;  %v270_v26 = vld [vmem:[#allocation2 + $0xa8] sm:$0xff]  ;;  %v2823_v28 = vpack.c.bf16 %v261_v20, %v257_v18  ;;  %v251_v29 = vld [vmem:[#allocation2 + $0x10] sm:$0xff]  ;;  %v265_v33 = vld [vmem:[#allocation2 + $0x80] sm:$0xff]  ;;  %p2706_p2 = scmp.ne.s32.totalorder %s1894_s29, %s2705_s30  ;;  %p2710_p3 = scmp.lt.s32.totalorder %s1894_s29, %s1894_s29 }
  0x2d   :  { %1990 = vmatprep.subr.bf16.mxu0 %v2816_v19  ;;  %v255_v30 = vld [vmem:[#allocation2 + $0x30] sm:$0xff]  ;;  %v269_v34 = vld [vmem:[#allocation2 + $0xa0] sm:$0xff]  ;;  %v260_v35 = vld [vmem:[#allocation2 + $0x58] sm:$0xff]  ;;  %v2829_v36 = vpack.c.bf16 %v270_v26, %v266_v25  ;;  %p2711_p4 = scmp.lt.s32.totalorder %s2709_s7, %s2705_s30 }
  0x2e   :  { %v84_v15 = vrot.slane %v53_v12, %v83_v6  ;;  %v91_v23 = vrot.slane %v77_v14, %v83_v6  ;;  %v264_v37 = vld [vmem:[#allocation2 + $0x78] sm:$0xff]  ;;  %v274_v38 = vld [vmem:[#allocation2 + $0xc8] sm:$0xff]  ;;  %v2835_v40 = vpack.c.bf16 %v255_v30, %v251_v29  ;;  %v2837_v41 = vpack.c.bf16 %v269_v34, %v265_v33  ;;  %v259_v42 = vld [vmem:[#allocation2 + $0x50] sm:$0xff] }
  0x2f   :  { %v278_v39 = vld [vmem:[#allocation2 + $0xe8] sm:$0xff]  ;;  %v263_v43 = vld [vmem:[#allocation2 + $0x70] sm:$0xff]  ;;  %v2841_v44 = vpack.c.bf16 %v264_v37, %v260_v35  ;;  %v273_v46 = vld [vmem:[#allocation2 + $0xc0] sm:$0xff]  ;;  %p2712_p5 = por %p2711_p4, %p2710_p3 }
  0x30   :  { %v92_v24 = vcombine.high %v84_v15, %v84_v15  ;;  %v93_v31 = vcombine.high %v91_v23, %v91_v23  ;;  %1992 = vmatpush1.bf16.msra.mxu0 %v2823_v28  ;;  %v2843_v45 = vpack.c.bf16 %v278_v39, %v274_v38  ;;  %v277_v47 = vld [vmem:[#allocation2 + $0xe0] sm:$0xff]  ;;  %v268_v48 = vld [vmem:[#allocation2 + $0x98] sm:$0xff]  ;;  %v282_v50 = vld [vmem:[#allocation2 + $0x108] sm:$0xff]  ;;  %v2849_v52 = vpack.c.bf16 %v263_v43, %v259_v42 }
  0x31   :  { %1994 = vmatprep.subr.bf16.mxu0 %v2829_v36  ;;  %v272_v49 = vld [vmem:[#allocation2 + $0xb8] sm:$0xff]  ;;  %v286_v51 = vld [vmem:[#allocation2 + $0x128] sm:$0xff]  ;;  %v2851_v53 = vpack.c.bf16 %v277_v47, %v273_v46  ;;  %v267_v54 = vld [vmem:[#allocation2 + $0x90] sm:$0xff]  ;;  %p2713_p6 = pnand %p2712_p5, %p2706_p2 }
  0x32   :  { %1903 = vmatprep.subr.msk.mxu1 %vm98_vm0, %v92_v24  ;;  %v271_v55 = vld [vmem:[#allocation2 + $0xb0] sm:$0xff]  ;;  %v2855_v56 = vpack.c.bf16 %v272_v49, %v268_v48  ;;  %v2857_v57 = vpack.c.bf16 %v286_v51, %v282_v50  ;;  %v281_v58 = vld [vmem:[#allocation2 + $0x100] sm:$0xff]  ;;  %v276_v60 = vld [vmem:[#allocation2 + $0xd8] sm:$0xff] }
  0x33   :  { %1904 = vmatpush1.msk.msra.mxu1 %vm98_vm0, %v84_v15  ;;  %v285_v59 = vld [vmem:[#allocation2 + $0x120] sm:$0xff]  ;;  %v280_v61 = vld [vmem:[#allocation2 + $0xf8] sm:$0xff]  ;;  %v290_v62 = vld [vmem:[#allocation2 + $0x148] sm:$0xff]  ;;  %v2862_v0 = vpack.c.bf16 %v271_v55, %v267_v54 }
  0x34   :  { %1905 = vmatmul.mubr.msk.f32.vlgmr.msra.gmra.mrb[0].mxu1 %vm94_vm1, %v52_v27  ;;  %1906 = vmatprep.subr.msk.mxu1 %vm98_vm0, %v93_v31  ;;  %v294_v63 = vld [vmem:[#allocation2 + $0x168] sm:$0xff]  ;;  %v2864_v1 = vpack.c.bf16 %v285_v59, %v281_v58  ;;  %v275_v2 = vld [vmem:[#allocation2 + $0xd0] sm:$0xff]  ;;  %v2868_v6 = vpack.c.bf16 %v280_v61, %v276_v60  ;;  %v289_v8 = vld [vmem:[#allocation2 + $0x140] sm:$0xff] }
  0x35   :  { %1907 = vmatpush1.msk.msra.mxu1 %vm98_vm0, %v91_v23  ;;  %242 = vmatprep.mubr.f32.mxu1 %v2740_v3  ;;  %v279_v5 = vld [vmem:[#allocation2 + $0xf0] sm:$0xff]  ;;  %v2870_v7 = vpack.c.bf16 %v294_v63, %v290_v62  ;;  %v293_v9 = vld [vmem:[#allocation2 + $0x160] sm:$0xff]  ;;  %v284_v11 = vld [vmem:[#allocation2 + $0x118] sm:$0xff] }
  0x36   :  { %2018 = vmatprep.subr.bf16.mxu1 %v2826_v32  ;;  %1996 = vmatpush1.bf16.msra.mxu0 %v2837_v41  ;;  %v288_v12 = vld [vmem:[#allocation2 + $0x138] sm:$0xff]  ;;  %v298_v14 = vld [vmem:[#allocation2 + $0x188] sm:$0xff]  ;;  %v2874_v16 = vpack.c.bf16 %v279_v5, %v275_v2  ;;  %v2876_v17 = vpack.c.bf16 %v293_v9, %v289_v8  ;;  %v283_v18 = vld [vmem:[#allocation2 + $0x110] sm:$0xff]  ;;  %v58_v8 = vsub.s32 0, %v2805_v4 }
  0x37   :  { %1998 = vmatprep.subr.bf16.mxu0 %v2843_v45  ;;  %v302_v15 = vld [vmem:[#allocation2 + $0x1a8] sm:$0xff]  ;;  %v287_v20 = vld [vmem:[#allocation2 + $0x130] sm:$0xff]  ;;  %v2880_v21 = vpack.c.bf16 %v288_v12, %v284_v11  ;;  %v297_v23 = vld [vmem:[#allocation2 + $0x180] sm:$0xff]  ;;  %v62_v11 = vsub.s32 1, %v2805_v4 }
  0x38   :  { %1908 = vmatmul.mubr.msk.f32.vlgmr.msra.gmra.mrb[2].mxu1 %vm94_vm1, %v52_v27  ;;  %v2882_v22 = vpack.c.bf16 %v302_v15, %v298_v14  ;;  %v301_v24 = vld [vmem:[#allocation2 + $0x1a0] sm:$0xff]  ;;  %v292_v25 = vld [vmem:[#allocation2 + $0x158] sm:$0xff]  ;;  %v306_v27 = vld [vmem:[#allocation2 + $0x1c8] sm:$0xff]  ;;  %v2886_v30 = vpack.c.bf16 %v287_v20, %v283_v18  ;;  %v66_v18 = vsub.s32 2, %v2805_v4 }
  0x39   :  { %2020 = vmatpush1.bf16.msra.mxu1 %v2835_v40  ;;  %448 = vmatprep.mubr.f32.mxu1 %v2740_v3  ;;  %v296_v26 = vld [vmem:[#allocation2 + $0x178] sm:$0xff]  ;;  %v310_v29 = vld [vmem:[#allocation2 + $0x1e8] sm:$0xff]  ;;  %v2888_v31 = vpack.c.bf16 %v301_v24, %v297_v23  ;;  %v291_v33 = vld [vmem:[#allocation2 + $0x150] sm:$0xff] }
  0x3a   :  { %2022 = vmatprep.subr.bf16.mxu1 %v2841_v44  ;;  %2000 = vmatpush1.bf16.msra.mxu0 %v2851_v53  ;;  %v2892_v34 = vpack.c.bf16 %v296_v26, %v292_v25  ;;  %v2894_v35 = vpack.c.bf16 %v310_v29, %v306_v27  ;;  %v295_v37 = vld [vmem:[#allocation2 + $0x170] sm:$0xff]  ;;  %v305_v38 = vld [vmem:[#allocation2 + $0x1c0] sm:$0xff]  ;;  %v300_v42 = vld [vmem:[#allocation2 + $0x198] sm:$0xff]  ;;  %v70_v29 = vsub.s32 3, %v2805_v4 }
  0x3b   :  { %2002 = vmatprep.subr.bf16.mxu0 %v2857_v57  ;;  %v309_v39 = vld [vmem:[#allocation2 + $0x1e0] sm:$0xff]  ;;  %v304_v43 = vld [vmem:[#allocation2 + $0x1b8] sm:$0xff]  ;;  %v2898_v46 = vpack.c.bf16 %v295_v37, %v291_v33  ;;  %v299_v49 = vld [vmem:[#allocation2 + $0x190] sm:$0xff] }
  0x3c   :  { %v2900_v47 = vpack.c.bf16 %v309_v39, %v305_v38  ;;  %v2904_v48 = vpack.c.bf16 %v304_v43, %v300_v42  ;;  %v303_v50 = vld [vmem:[#allocation2 + $0x1b0] sm:$0xff]  ;;  %v308_v51 = vld [vmem:[#allocation2 + $0x1d8] sm:$0xff] }
  0x3d   :  { %2024 = vmatpush1.bf16.msra.mxu1 %v2849_v52  ;;  %v312_v54 = vld [vmem:[#allocation2 + $0x1f8] sm:$0xff]  ;;  %v2908_v55 = vpack.c.bf16 %v303_v50, %v299_v49  ;;  %v307_v59 = vld [vmem:[#allocation2 + $0x1d0] sm:$0xff] }
  0x3e   :  { %2026 = vmatprep.subr.bf16.mxu1 %v2855_v56  ;;  %2004 = vmatpush1.bf16.msra.mxu0 %v2864_v1  ;;  %v2911_v58 = vpack.c.bf16 %v312_v54, %v308_v51  ;;  %v311_v60 = vld [vmem:[#allocation2 + $0x1f0] sm:$0xff]  ;;  %v54_v9 = vld [vmem:[%s3252_s3] sm:$0xf] }
  0x3f   :  { %2006 = vmatprep.subr.bf16.mxu0 %v2870_v7  ;;  %v2916_v61 = vpack.c.bf16 %v311_v60, %v307_v59  ;;  %v59_v12 = vrot.slane %v54_v9, %v58_v8  ;;  %v63_v14 = vrot.slane %v54_v9, %v62_v11  ;;  %v67_v27 = vrot.slane %v54_v9, %v66_v18 }
  0x40   :  { %v71_v39 = vrot.slane %v54_v9, %v70_v29 }
  0x41   :  { %2028 = vmatpush1.bf16.msra.mxu1 %v2862_v0 }
  0x42   :  { %2030 = vmatprep.subr.bf16.mxu1 %v2868_v6  ;;  %2008 = vmatpush1.bf16.msra.mxu0 %v2876_v17 }
  0x43   :  { %2010 = vmatprep.subr.bf16.mxu0 %v2882_v22 }
  0x45   :  { %2032 = vmatpush1.bf16.msra.mxu1 %v2874_v16 }
  0x46   :  { %2034 = vmatprep.subr.bf16.mxu1 %v2880_v21  ;;  %2012 = vmatpush1.bf16.msra.mxu0 %v2888_v31 }
  0x47   :  { %2014 = vmatprep.subr.bf16.mxu0 %v2894_v35 }
  0x49   :  { %2036 = vmatpush1.bf16.msra.mxu1 %v2886_v30 }
  0x4a   :  { %2038 = vmatprep.subr.bf16.mxu1 %v2892_v34  ;;  %2016 = vmatpush1.bf16.msra.mxu0 %v2900_v47 }
  0x4b   :  { %2050 = vmatprep.subr.bf16.mxu0 %v2808_v10 }
  0x4d   :  { %2040 = vmatpush1.bf16.msra.mxu1 %v2898_v46  ;;  %378 = vmatmul.mubr.f32.vlgmr.msra.gmra.mrb[0].mxu0 %v2740_v3 }
  0x4e   :  { %2042 = vmatprep.subr.bf16.mxu1 %v2904_v48  ;;  %2052 = vmatpush1.bf16.msra.mxu0 %v2813_v13 }
  0x4f   :  { %2054 = vmatprep.subr.bf16.mxu0 %v2816_v19  ;;  %547 = vmatprep.mubr.f32.mxu0 %v2740_v3 }
  0x51   :  { %2044 = vmatpush1.bf16.msra.mxu1 %v2908_v55 }
  0x52   :  { %2046 = vmatprep.subr.bf16.mxu1 %v2911_v58  ;;  %2056 = vmatpush1.bf16.msra.mxu0 %v2823_v28 }
  0x53   :  { %2058 = vmatprep.subr.bf16.mxu0 %v2829_v36 }
  0x55   :  { %2048 = vmatpush1.bf16.msra.mxu1 %v2916_v61 }
  0x56   :  { %2082 = vmatprep.subr.bf16.mxu1 %v2826_v32  ;;  %2060 = vmatpush1.bf16.msra.mxu0 %v2837_v41 }
  0x57   :  { %2062 = vmatprep.subr.bf16.mxu0 %v2843_v45 }
  0x58   :  { %449 = vmatmul.mubr.f32.vlgmr.msra.gmra.mrb[4].mxu1 %v2740_v3 }
  0x59   :  { %2084 = vmatpush1.bf16.msra.mxu1 %v2835_v40  ;;  %618 = vmatprep.mubr.f32.mxu1 %v2740_v3 }
  0x5a   :  { %2086 = vmatprep.subr.bf16.mxu1 %v2841_v44  ;;  %2064 = vmatpush1.bf16.msra.mxu0 %v2851_v53 }
  0x5b   :  { %2066 = vmatprep.subr.bf16.mxu0 %v2857_v57 }
  0x5d   :  { %2088 = vmatpush1.bf16.msra.mxu1 %v2849_v52 }
  0x5e   :  { %2090 = vmatprep.subr.bf16.mxu1 %v2855_v56  ;;  %2068 = vmatpush1.bf16.msra.mxu0 %v2864_v1 }
  0x5f   :  { %2070 = vmatprep.subr.bf16.mxu0 %v2870_v7 }
  0x61   :  { %2092 = vmatpush1.bf16.msra.mxu1 %v2862_v0 }
  0x62   :  { %2094 = vmatprep.subr.bf16.mxu1 %v2868_v6  ;;  %2072 = vmatpush1.bf16.msra.mxu0 %v2876_v17 }
  0x63   :  { %2074 = vmatprep.subr.bf16.mxu0 %v2882_v22 }
  0x65   :  { %2096 = vmatpush1.bf16.msra.mxu1 %v2874_v16 }
  0x66   :  { %2098 = vmatprep.subr.bf16.mxu1 %v2880_v21  ;;  %2076 = vmatpush1.bf16.msra.mxu0 %v2888_v31 }
  0x67   :  { %2078 = vmatprep.subr.bf16.mxu0 %v2894_v35 }
  0x69   :  { %2100 = vmatpush1.bf16.msra.mxu1 %v2886_v30 }
  0x6a   :  { %2102 = vmatprep.subr.bf16.mxu1 %v2892_v34  ;;  %2080 = vmatpush1.bf16.msra.mxu0 %v2900_v47 }
  0x6b   :  { %2114 = vmatprep.subr.bf16.mxu0 %v2808_v10 }
  0x6d   :  { %2104 = vmatpush1.bf16.msra.mxu1 %v2898_v46 }
  0x6e   :  { %2106 = vmatprep.subr.bf16.mxu1 %v2904_v48 }
  0x71   :  { %2108 = vmatpush1.bf16.msra.mxu1 %v2908_v55 }
  0x72   :  { %2110 = vmatprep.subr.bf16.mxu1 %v2911_v58 }
  0x75   :  { %2112 = vmatpush1.bf16.msra.mxu1 %v2916_v61 }
  0x76   :  { %2146 = vmatprep.subr.bf16.mxu1 %v2826_v32 }
 0x107   :  { %v173_v62 = vpop.f32.mrb[0].mxu1 }
 0x108   :  { %v175_v63 = vpop.f32.mrb[1].mxu1  ;;  %v2961_v15 = vadd.f32 %v173_v62, %v59_v12 }
 0x109   :  { %v2964_v20 = vadd.f32 %v175_v63, %v63_v14 }
 0x10b   :  { %v244_v2 = vpop.f32.mrb[2].mxu1 }
 0x10c   :  { %v246_v5 = vpop.f32.mrb[3].mxu1  ;;  %v2969_v38 = vadd.f32 %v244_v2, %v67_v27 }
 0x10d   :  { %v2972_v50 = vadd.f32 %v246_v5, %v71_v39 }
 0x120   :  { %v379_v23 = vpop.f32.mrb[0].mxu0 }
 0x121   :  { %v455_v24 = vadd.f32 %v379_v23, %v2961_v15  ;;  %v381_v25 = vpop.f32.mrb[1].mxu0 }
 0x122   :  { %v456_v26 = vadd.f32 %v381_v25, %v2964_v20 }
 0x123   :  { %v1909_v33 = vmul.f32 -1.442695, %v455_v24 }
 0x124   :  { %v1910_v37 = vmul.f32 -1.442695, %v456_v26 }
 0x125   :  { %2533 = vpow2.f32 %v1909_v33 }
 0x126   :  { %2535 = vpow2.f32 %v1910_v37 }
 0x12b   :  { %v450_v42 = vpop.f32.mrb[4].mxu1 }
 0x12c   :  { %v457_v43 = vadd.f32 %v450_v42, %v2969_v38  ;;  %v452_v49 = vpop.f32.mrb[5].mxu1 }
 0x12d   :  { %v458_v54 = vadd.f32 %v452_v49, %v2972_v50 }
 0x12e   :  { %v1911_v51 = vmul.f32 -1.442695, %v457_v43 }
 0x12f   :  { %v2534_v59 = vpop.eup %2533 }
 0x130   :  { %v2536_v60 = vpop.eup %2535  ;;  %v468_v62 = vadd.f32 1.0, %v2534_v59  ;;  %2537 = vpow2.f32 %v1911_v51 }
 0x131   :  { %v469_v4 = vadd.f32 1.0, %v2536_v60  ;;  %2539 = vtanh.f32 %v458_v54 }
 0x132   :  { %2541 = vrcp.f32 %v468_v62 }
 0x133   :  { %2543 = vrcp.f32 %v469_v4 }
 0x13a   :  { %v2538_v63 = vpop.eup %2537 }
 0x13b   :  { %v2540_v2 = vpop.eup %2539  ;;  %v470_v11 = vadd.f32 1.0, %v2538_v63 }
 0x13c   :  { %v2542_v8 = vpop.eup %2541 }
 0x13d   :  { %v2544_v9 = vpop.eup %2543  ;;  %v479_v12 = vmul.f32 %v2542_v8, %v2540_v2  ;;  %2545 = vrcp.f32 %v470_v11 }
 0x13e   :  { %v478_v14 = vmul.f32 0.0, %v2544_v9 }
 0x140   :  { %v2975_v5 = vadd.f32 %v479_v12, %v478_v14 }
 0x142   :  { %2547 = vtanh.f32 %v2975_v5  ;;  %v661_v14 = vrot.slane %v2975_v5, 7 }
 0x147   :  { %v2546_v18 = vpop.eup %2545 }
 0x14c   :  { %v2548_v23 = vpop.eup %2547 }
 0x14d   :  { %v482_v24 = vmul.f32 %v2548_v23, %v2546_v18 }
 0x14f   :  { %548 = vmatmul.mubr.f32.vlgmr.msra.gmra.mrb[2].mxu0 %v482_v24  ;;  %619 = vmatmul.mubr.f32.vlgmr.msra.gmra.mrb[6].mxu1 %v482_v24 }
 0x150   :  { %2116 = vmatpush1.bf16.msra.mxu0 %v2813_v13  ;;  %2148 = vmatpush1.bf16.msra.mxu1 %v2835_v40 }
 0x151   :  { %2118 = vmatprep.subr.bf16.mxu0 %v2816_v19  ;;  %2150 = vmatprep.subr.bf16.mxu1 %v2841_v44 }
 0x152   :  { %735 = vmatprep.mubr.f32.mxu0 %v2740_v3  ;;  %806 = vmatprep.mubr.f32.mxu1 %v2740_v3 }
 0x154   :  { %2120 = vmatpush1.bf16.msra.mxu0 %v2823_v28  ;;  %2152 = vmatpush1.bf16.msra.mxu1 %v2849_v52 }
 0x155   :  { %2122 = vmatprep.subr.bf16.mxu0 %v2829_v36  ;;  %2154 = vmatprep.subr.bf16.mxu1 %v2855_v56 }
 0x158   :  { %2124 = vmatpush1.bf16.msra.mxu0 %v2837_v41  ;;  %2156 = vmatpush1.bf16.msra.mxu1 %v2862_v0 }
 0x159   :  { %2126 = vmatprep.subr.bf16.mxu0 %v2843_v45  ;;  %2158 = vmatprep.subr.bf16.mxu1 %v2868_v6 }
 0x15c   :  { %2128 = vmatpush1.bf16.msra.mxu0 %v2851_v53  ;;  %2160 = vmatpush1.bf16.msra.mxu1 %v2874_v16 }
 0x15d   :  { %2130 = vmatprep.subr.bf16.mxu0 %v2857_v57  ;;  %2162 = vmatprep.subr.bf16.mxu1 %v2880_v21 }
 0x160   :  { %2132 = vmatpush1.bf16.msra.mxu0 %v2864_v1  ;;  %2164 = vmatpush1.bf16.msra.mxu1 %v2886_v30 }
 0x161   :  { %2134 = vmatprep.subr.bf16.mxu0 %v2870_v7  ;;  %2166 = vmatprep.subr.bf16.mxu1 %v2892_v34 }
 0x164   :  { %2136 = vmatpush1.bf16.msra.mxu0 %v2876_v17  ;;  %2168 = vmatpush1.bf16.msra.mxu1 %v2898_v46 }
 0x165   :  { %2138 = vmatprep.subr.bf16.mxu0 %v2882_v22  ;;  %2170 = vmatprep.subr.bf16.mxu1 %v2904_v48 }
 0x168   :  { %2140 = vmatpush1.bf16.msra.mxu0 %v2888_v31  ;;  %2172 = vmatpush1.bf16.msra.mxu1 %v2908_v55 }
 0x169   :  { %2142 = vmatprep.subr.bf16.mxu0 %v2894_v35  ;;  %2174 = vmatprep.subr.bf16.mxu1 %v2911_v58 }
 0x16c   :  { %2144 = vmatpush1.bf16.msra.mxu0 %v2900_v47  ;;  %2176 = vmatpush1.bf16.msra.mxu1 %v2916_v61 }
 0x16d   :  { %2178 = vmatprep.subr.bf16.mxu0 %v2808_v10  ;;  %2210 = vmatprep.subr.bf16.mxu1 %v2826_v32 }
 0x222   :  { %v549_v25 = vpop.f32.mrb[2].mxu0  ;;  %v620_v26 = vpop.f32.mrb[6].mxu1 }
 0x223   :  { %v629_v27 = vrot.slane %v549_v25, 7  ;;  %v551_v29 = vpop.f32.mrb[3].mxu0  ;;  %v622_v33 = vpop.f32.mrb[7].mxu1  ;;  %v631_v51 = vrot.slane %v620_v26, 7 }
 0x224   :  { %v630_v37 = vrot.slane %v551_v29, 7  ;;  %v632_v54 = vrot.slane %v622_v33, 7 }
 0x225   :  { %v637_v39 = vadd.f32 %v629_v27, %v2961_v15  ;;  %v639_v59 = vadd.f32 %v631_v51, %v2969_v38 }
 0x226   :  { %v638_v42 = vadd.f32 %v630_v37, %v2964_v20  ;;  %v640_v60 = vadd.f32 %v632_v54, %v2972_v50 }
 0x227   :  { %v1912_v43 = vmul.f32 -1.442695, %v637_v39  ;;  %v1914_v62 = vmul.f32 -1.442695, %v639_v59 }
 0x228   :  { %v1913_v49 = vmul.f32 -1.442695, %v638_v42 }
 0x229   :  { %2549 = vpow2.f32 %v1912_v43 }
 0x22a   :  { %2551 = vpow2.f32 %v1913_v49 }
 0x22b   :  { %2553 = vtanh.f32 %v640_v60 }
 0x22c   :  { %2555 = vpow2.f32 %v1914_v62 }
 0x233   :  { %v2550_v4 = vpop.eup %2549 }
 0x234   :  { %v650_v63 = vadd.f32 1.0, %v2550_v4  ;;  %v2552_v2 = vpop.eup %2551 }
 0x235   :  { %v651_v8 = vadd.f32 1.0, %v2552_v2  ;;  %v2554_v9 = vpop.eup %2553 }
 0x236   :  { %2557 = vrcp.f32 %v650_v63  ;;  %v2556_v11 = vpop.eup %2555 }
 0x237   :  { %2559 = vrcp.f32 %v651_v8  ;;  %v652_v24 = vadd.f32 1.0, %v2556_v11 }
 0x239   :  { %2561 = vrcp.f32 %v652_v24 }
 0x240   :  { %v2558_v12 = vpop.eup %2557 }
 0x241   :  { %v664_v18 = vmul.f32 %v2558_v12, %v2554_v9  ;;  %v2560_v23 = vpop.eup %2559 }
 0x242   :  { %v663_v25 = vmul.f32 %v2560_v23, %v661_v14 }
 0x243   :  { %v2562_v27 = vpop.eup %2561 }
 0x244   :  { %v3017_v26 = vadd.f32 %v664_v18, %v663_v25 }
 0x246   :  { %2563 = vtanh.f32 %v3017_v26 }
 0x250   :  { %v2564_v29 = vpop.eup %2563 }
 0x251   :  { %v667_v33 = vmul.f32 %v2564_v29, %v2562_v27  ;;  %v849_v27 = vrot.slane %v3017_v26, 7 }
 0x253   :  { %v669_v37 = vrot.slane %v667_v33, 1 }
 0x255   :  { %736 = vmatmul.mubr.f32.vlgmr.msra.gmra.mrb[4].mxu0 %v669_v37  ;;  %807 = vmatmul.mubr.f32.vlgmr.msra.gmra.mrb[8].mxu1 %v669_v37 }
 0x256   :  { %2180 = vmatpush1.bf16.msra.mxu0 %v2813_v13  ;;  %2212 = vmatpush1.bf16.msra.mxu1 %v2835_v40 }
 0x257   :  { %2182 = vmatprep.subr.bf16.mxu0 %v2816_v19  ;;  %2214 = vmatprep.subr.bf16.mxu1 %v2841_v44 }
 0x258   :  { %923 = vmatprep.mubr.f32.mxu0 %v2740_v3  ;;  %994 = vmatprep.mubr.f32.mxu1 %v2740_v3 }
 0x25a   :  { %2184 = vmatpush1.bf16.msra.mxu0 %v2823_v28  ;;  %2216 = vmatpush1.bf16.msra.mxu1 %v2849_v52 }
 0x25b   :  { %2186 = vmatprep.subr.bf16.mxu0 %v2829_v36  ;;  %2218 = vmatprep.subr.bf16.mxu1 %v2855_v56 }
 0x25e   :  { %2188 = vmatpush1.bf16.msra.mxu0 %v2837_v41  ;;  %2220 = vmatpush1.bf16.msra.mxu1 %v2862_v0 }
 0x25f   :  { %2190 = vmatprep.subr.bf16.mxu0 %v2843_v45  ;;  %2222 = vmatprep.subr.bf16.mxu1 %v2868_v6 }
 0x262   :  { %2192 = vmatpush1.bf16.msra.mxu0 %v2851_v53  ;;  %2224 = vmatpush1.bf16.msra.mxu1 %v2874_v16 }
 0x263   :  { %2194 = vmatprep.subr.bf16.mxu0 %v2857_v57  ;;  %2226 = vmatprep.subr.bf16.mxu1 %v2880_v21 }
 0x266   :  { %2196 = vmatpush1.bf16.msra.mxu0 %v2864_v1  ;;  %2228 = vmatpush1.bf16.msra.mxu1 %v2886_v30 }
 0x267   :  { %2198 = vmatprep.subr.bf16.mxu0 %v2870_v7  ;;  %2230 = vmatprep.subr.bf16.mxu1 %v2892_v34 }
 0x26a   :  { %2200 = vmatpush1.bf16.msra.mxu0 %v2876_v17  ;;  %2232 = vmatpush1.bf16.msra.mxu1 %v2898_v46 }
 0x26b   :  { %2202 = vmatprep.subr.bf16.mxu0 %v2882_v22  ;;  %2234 = vmatprep.subr.bf16.mxu1 %v2904_v48 }
 0x26e   :  { %2204 = vmatpush1.bf16.msra.mxu0 %v2888_v31  ;;  %2236 = vmatpush1.bf16.msra.mxu1 %v2908_v55 }
 0x26f   :  { %2206 = vmatprep.subr.bf16.mxu0 %v2894_v35  ;;  %2238 = vmatprep.subr.bf16.mxu1 %v2911_v58 }
 0x272   :  { %2208 = vmatpush1.bf16.msra.mxu0 %v2900_v47  ;;  %2240 = vmatpush1.bf16.msra.mxu1 %v2916_v61 }
 0x273   :  { %2242 = vmatprep.subr.bf16.mxu0 %v2808_v10  ;;  %2274 = vmatprep.subr.bf16.mxu1 %v2826_v32 }
 0x328   :  { %v737_v5 = vpop.f32.mrb[4].mxu0  ;;  %v808_v39 = vpop.f32.mrb[8].mxu1 }
 0x329   :  { %v817_v42 = vrot.slane %v737_v5, 6  ;;  %v739_v43 = vpop.f32.mrb[5].mxu0  ;;  %v810_v49 = vpop.f32.mrb[9].mxu1  ;;  %v819_v4 = vrot.slane %v808_v39, 6 }
 0x32a   :  { %v818_v51 = vrot.slane %v739_v43, 6  ;;  %v820_v63 = vrot.slane %v810_v49, 6 }
 0x32b   :  { %v825_v54 = vadd.f32 %v817_v42, %v2961_v15  ;;  %v827_v2 = vadd.f32 %v819_v4, %v2969_v38 }
 0x32c   :  { %v826_v59 = vadd.f32 %v818_v51, %v2964_v20  ;;  %v828_v8 = vadd.f32 %v820_v63, %v2972_v50 }
 0x32d   :  { %v1915_v60 = vmul.f32 -1.442695, %v825_v54  ;;  %v1917_v9 = vmul.f32 -1.442695, %v827_v2 }
 0x32e   :  { %v1916_v62 = vmul.f32 -1.442695, %v826_v59 }
 0x32f   :  { %2565 = vpow2.f32 %v1915_v60 }
 0x330   :  { %2567 = vpow2.f32 %v1916_v62 }
 0x331   :  { %2569 = vtanh.f32 %v828_v8 }
 0x332   :  { %2571 = vpow2.f32 %v1917_v9 }
 0x339   :  { %v2566_v11 = vpop.eup %2565 }
 0x33a   :  { %v838_v12 = vadd.f32 1.0, %v2566_v11  ;;  %v2568_v14 = vpop.eup %2567 }
 0x33b   :  { %v839_v18 = vadd.f32 1.0, %v2568_v14  ;;  %v2570_v23 = vpop.eup %2569 }
 0x33c   :  { %2573 = vrcp.f32 %v838_v12  ;;  %v2572_v24 = vpop.eup %2571 }
 0x33d   :  { %2575 = vrcp.f32 %v839_v18  ;;  %v840_v37 = vadd.f32 1.0, %v2572_v24 }
 0x33f   :  { %2577 = vrcp.f32 %v840_v37 }
 0x346   :  { %v2574_v25 = vpop.eup %2573 }
 0x347   :  { %v852_v29 = vmul.f32 %v2574_v25, %v2570_v23  ;;  %v2576_v33 = vpop.eup %2575 }
 0x348   :  { %v851_v5 = vmul.f32 %v2576_v33, %v849_v27 }
 0x349   :  { %v2578_v42 = vpop.eup %2577 }
 0x34a   :  { %v3059_v39 = vadd.f32 %v852_v29, %v851_v5 }
 0x34c   :  { %2579 = vtanh.f32 %v3059_v39 }
 0x356   :  { %v2580_v43 = vpop.eup %2579 }
 0x357   :  { %v855_v49 = vmul.f32 %v2580_v43, %v2578_v42  ;;  %v1037_v42 = vrot.slane %v3059_v39, 7 }
 0x359   :  { %v857_v51 = vrot.slane %v855_v49, 2 }
 0x35b   :  { %924 = vmatmul.mubr.f32.vlgmr.msra.gmra.mrb[6].mxu0 %v857_v51  ;;  %995 = vmatmul.mubr.f32.vlgmr.msra.gmra.mrb[10].mxu1 %v857_v51 }
 0x35c   :  { %2244 = vmatpush1.bf16.msra.mxu0 %v2813_v13  ;;  %2276 = vmatpush1.bf16.msra.mxu1 %v2835_v40 }
 0x35d   :  { %2246 = vmatprep.subr.bf16.mxu0 %v2816_v19  ;;  %2278 = vmatprep.subr.bf16.mxu1 %v2841_v44 }
 0x35e   :  { %1111 = vmatprep.mubr.f32.mxu0 %v2740_v3  ;;  %1182 = vmatprep.mubr.f32.mxu1 %v2740_v3 }
 0x360   :  { %2248 = vmatpush1.bf16.msra.mxu0 %v2823_v28  ;;  %2280 = vmatpush1.bf16.msra.mxu1 %v2849_v52 }
 0x361   :  { %2250 = vmatprep.subr.bf16.mxu0 %v2829_v36  ;;  %2282 = vmatprep.subr.bf16.mxu1 %v2855_v56 }
 0x364   :  { %2252 = vmatpush1.bf16.msra.mxu0 %v2837_v41  ;;  %2284 = vmatpush1.bf16.msra.mxu1 %v2862_v0 }
 0x365   :  { %2254 = vmatprep.subr.bf16.mxu0 %v2843_v45  ;;  %2286 = vmatprep.subr.bf16.mxu1 %v2868_v6 }
 0x368   :  { %2256 = vmatpush1.bf16.msra.mxu0 %v2851_v53  ;;  %2288 = vmatpush1.bf16.msra.mxu1 %v2874_v16 }
 0x369   :  { %2258 = vmatprep.subr.bf16.mxu0 %v2857_v57  ;;  %2290 = vmatprep.subr.bf16.mxu1 %v2880_v21 }
 0x36c   :  { %2260 = vmatpush1.bf16.msra.mxu0 %v2864_v1  ;;  %2292 = vmatpush1.bf16.msra.mxu1 %v2886_v30 }
 0x36d   :  { %2262 = vmatprep.subr.bf16.mxu0 %v2870_v7  ;;  %2294 = vmatprep.subr.bf16.mxu1 %v2892_v34 }
 0x370   :  { %2264 = vmatpush1.bf16.msra.mxu0 %v2876_v17  ;;  %2296 = vmatpush1.bf16.msra.mxu1 %v2898_v46 }
 0x371   :  { %2266 = vmatprep.subr.bf16.mxu0 %v2882_v22  ;;  %2298 = vmatprep.subr.bf16.mxu1 %v2904_v48 }
 0x374   :  { %2268 = vmatpush1.bf16.msra.mxu0 %v2888_v31  ;;  %2300 = vmatpush1.bf16.msra.mxu1 %v2908_v55 }
 0x375   :  { %2270 = vmatprep.subr.bf16.mxu0 %v2894_v35  ;;  %2302 = vmatprep.subr.bf16.mxu1 %v2911_v58 }
 0x378   :  { %2272 = vmatpush1.bf16.msra.mxu0 %v2900_v47  ;;  %2304 = vmatpush1.bf16.msra.mxu1 %v2916_v61 }
 0x379   :  { %2306 = vmatprep.subr.bf16.mxu0 %v2808_v10  ;;  %2338 = vmatprep.subr.bf16.mxu1 %v2826_v32 }
 0x42e   :  { %v925_v26 = vpop.f32.mrb[6].mxu0  ;;  %v996_v54 = vpop.f32.mrb[10].mxu1 }
 0x42f   :  { %v1005_v59 = vrot.slane %v925_v26, 5  ;;  %v927_v60 = vpop.f32.mrb[7].mxu0  ;;  %v998_v62 = vpop.f32.mrb[11].mxu1  ;;  %v1007_v11 = vrot.slane %v996_v54, 5 }
 0x430   :  { %v1006_v4 = vrot.slane %v927_v60, 5  ;;  %v1008_v12 = vrot.slane %v998_v62, 5 }
 0x431   :  { %v1013_v63 = vadd.f32 %v1005_v59, %v2961_v15  ;;  %v1015_v14 = vadd.f32 %v1007_v11, %v2969_v38 }
 0x432   :  { %v1014_v2 = vadd.f32 %v1006_v4, %v2964_v20  ;;  %v1016_v18 = vadd.f32 %v1008_v12, %v2972_v50 }
 0x433   :  { %v1918_v8 = vmul.f32 -1.442695, %v1013_v63  ;;  %v1920_v23 = vmul.f32 -1.442695, %v1015_v14 }
 0x434   :  { %v1919_v9 = vmul.f32 -1.442695, %v1014_v2 }
 0x435   :  { %2581 = vpow2.f32 %v1918_v8 }
 0x436   :  { %2583 = vpow2.f32 %v1919_v9 }
 0x437   :  { %2585 = vtanh.f32 %v1016_v18 }
 0x438   :  { %2587 = vpow2.f32 %v1920_v23 }
 0x43f   :  { %v2582_v24 = vpop.eup %2581 }
 0x440   :  { %v1026_v25 = vadd.f32 1.0, %v2582_v24  ;;  %v2584_v27 = vpop.eup %2583 }
 0x441   :  { %v1027_v29 = vadd.f32 1.0, %v2584_v27  ;;  %v2586_v33 = vpop.eup %2585 }
 0x442   :  { %2589 = vrcp.f32 %v1026_v25  ;;  %v2588_v37 = vpop.eup %2587 }
 0x443   :  { %2591 = vrcp.f32 %v1027_v29  ;;  %v1028_v51 = vadd.f32 1.0, %v2588_v37 }
 0x445   :  { %2593 = vrcp.f32 %v1028_v51 }
 0x44c   :  { %v2590_v5 = vpop.eup %2589 }
 0x44d   :  { %v1040_v43 = vmul.f32 %v2590_v5, %v2586_v33  ;;  %v2592_v49 = vpop.eup %2591 }
 0x44e   :  { %v1039_v26 = vmul.f32 %v2592_v49, %v1037_v42 }
 0x44f   :  { %v2594_v59 = vpop.eup %2593 }
 0x450   :  { %v3101_v54 = vadd.f32 %v1040_v43, %v1039_v26 }
 0x452   :  { %2595 = vtanh.f32 %v3101_v54 }
 0x45c   :  { %v2596_v60 = vpop.eup %2595 }
 0x45d   :  { %v1043_v62 = vmul.f32 %v2596_v60, %v2594_v59  ;;  %v1225_v59 = vrot.slane %v3101_v54, 7 }
 0x45f   :  { %v1045_v4 = vrot.slane %v1043_v62, 3 }
 0x461   :  { %1112 = vmatmul.mubr.f32.vlgmr.msra.gmra.mrb[8].mxu0 %v1045_v4  ;;  %1183 = vmatmul.mubr.f32.vlgmr.msra.gmra.mrb[12].mxu1 %v1045_v4 }
 0x462   :  { %2308 = vmatpush1.bf16.msra.mxu0 %v2813_v13  ;;  %2340 = vmatpush1.bf16.msra.mxu1 %v2835_v40 }
 0x463   :  { %2310 = vmatprep.subr.bf16.mxu0 %v2816_v19  ;;  %2342 = vmatprep.subr.bf16.mxu1 %v2841_v44 }
 0x464   :  { %1299 = vmatprep.mubr.f32.mxu0 %v2740_v3  ;;  %1370 = vmatprep.mubr.f32.mxu1 %v2740_v3 }
 0x466   :  { %2312 = vmatpush1.bf16.msra.mxu0 %v2823_v28  ;;  %2344 = vmatpush1.bf16.msra.mxu1 %v2849_v52 }
 0x467   :  { %2314 = vmatprep.subr.bf16.mxu0 %v2829_v36  ;;  %2346 = vmatprep.subr.bf16.mxu1 %v2855_v56 }
 0x46a   :  { %2316 = vmatpush1.bf16.msra.mxu0 %v2837_v41  ;;  %2348 = vmatpush1.bf16.msra.mxu1 %v2862_v0 }
 0x46b   :  { %2318 = vmatprep.subr.bf16.mxu0 %v2843_v45  ;;  %2350 = vmatprep.subr.bf16.mxu1 %v2868_v6 }
 0x46e   :  { %2320 = vmatpush1.bf16.msra.mxu0 %v2851_v53  ;;  %2352 = vmatpush1.bf16.msra.mxu1 %v2874_v16 }
 0x46f   :  { %2322 = vmatprep.subr.bf16.mxu0 %v2857_v57  ;;  %2354 = vmatprep.subr.bf16.mxu1 %v2880_v21 }
 0x472   :  { %2324 = vmatpush1.bf16.msra.mxu0 %v2864_v1  ;;  %2356 = vmatpush1.bf16.msra.mxu1 %v2886_v30 }
 0x473   :  { %2326 = vmatprep.subr.bf16.mxu0 %v2870_v7  ;;  %2358 = vmatprep.subr.bf16.mxu1 %v2892_v34 }
 0x476   :  { %2328 = vmatpush1.bf16.msra.mxu0 %v2876_v17  ;;  %2360 = vmatpush1.bf16.msra.mxu1 %v2898_v46 }
 0x477   :  { %2330 = vmatprep.subr.bf16.mxu0 %v2882_v22  ;;  %2362 = vmatprep.subr.bf16.mxu1 %v2904_v48 }
 0x47a   :  { %2332 = vmatpush1.bf16.msra.mxu0 %v2888_v31  ;;  %2364 = vmatpush1.bf16.msra.mxu1 %v2908_v55 }
 0x47b   :  { %2334 = vmatprep.subr.bf16.mxu0 %v2894_v35  ;;  %2366 = vmatprep.subr.bf16.mxu1 %v2911_v58 }
 0x47e   :  { %2336 = vmatpush1.bf16.msra.mxu0 %v2900_v47  ;;  %2368 = vmatpush1.bf16.msra.mxu1 %v2916_v61 }
 0x47f   :  { %2370 = vmatprep.subr.bf16.mxu0 %v2808_v10  ;;  %2402 = vmatprep.subr.bf16.mxu1 %v2826_v32 }
 0x534   :  { %v1113_v39 = vpop.f32.mrb[8].mxu0  ;;  %v1184_v63 = vpop.f32.mrb[12].mxu1 }
 0x535   :  { %v1193_v2 = vrot.slane %v1113_v39, 4  ;;  %v1115_v8 = vpop.f32.mrb[9].mxu0  ;;  %v1186_v9 = vpop.f32.mrb[13].mxu1  ;;  %v1195_v24 = vrot.slane %v1184_v63, 4 }
 0x536   :  { %v1194_v11 = vrot.slane %v1115_v8, 4  ;;  %v1196_v25 = vrot.slane %v1186_v9, 4 }
 0x537   :  { %v1201_v12 = vadd.f32 %v1193_v2, %v2961_v15  ;;  %v1203_v27 = vadd.f32 %v1195_v24, %v2969_v38 }
 0x538   :  { %v1202_v14 = vadd.f32 %v1194_v11, %v2964_v20  ;;  %v1204_v29 = vadd.f32 %v1196_v25, %v2972_v50 }
 0x539   :  { %v1921_v18 = vmul.f32 -1.442695, %v1201_v12  ;;  %v1923_v33 = vmul.f32 -1.442695, %v1203_v27 }
 0x53a   :  { %v1922_v23 = vmul.f32 -1.442695, %v1202_v14 }
 0x53b   :  { %2597 = vpow2.f32 %v1921_v18 }
 0x53c   :  { %2599 = vpow2.f32 %v1922_v23 }
 0x53d   :  { %2601 = vtanh.f32 %v1204_v29 }
 0x53e   :  { %2603 = vpow2.f32 %v1923_v33 }
 0x545   :  { %v2598_v37 = vpop.eup %2597 }
 0x546   :  { %v1214_v5 = vadd.f32 1.0, %v2598_v37  ;;  %v2600_v42 = vpop.eup %2599 }
 0x547   :  { %v1215_v43 = vadd.f32 1.0, %v2600_v42  ;;  %v2602_v49 = vpop.eup %2601 }
 0x548   :  { %2605 = vrcp.f32 %v1214_v5  ;;  %v2604_v51 = vpop.eup %2603 }
 0x549   :  { %2607 = vrcp.f32 %v1215_v43  ;;  %v1216_v4 = vadd.f32 1.0, %v2604_v51 }
 0x54b   :  { %2609 = vrcp.f32 %v1216_v4 }
 0x552   :  { %v2606_v26 = vpop.eup %2605 }
 0x553   :  { %v1228_v60 = vmul.f32 %v2606_v26, %v2602_v49  ;;  %v2608_v62 = vpop.eup %2607 }
 0x554   :  { %v1227_v39 = vmul.f32 %v2608_v62, %v1225_v59 }
 0x555   :  { %v2610_v2 = vpop.eup %2609 }
 0x556   :  { %v3143_v63 = vadd.f32 %v1228_v60, %v1227_v39 }
 0x558   :  { %2611 = vtanh.f32 %v3143_v63  ;;  %v1413_v4 = vrot.slane %v3143_v63, 7 }
 0x562   :  { %v2612_v8 = vpop.eup %2611 }
 0x563   :  { %v1231_v9 = vmul.f32 %v2612_v8, %v2610_v2 }
 0x565   :  { %v1233_v11 = vrot.slane %v1231_v9, 4 }
 0x567   :  { %1300 = vmatmul.mubr.f32.vlgmr.msra.gmra.mrb[10].mxu0 %v1233_v11  ;;  %1371 = vmatmul.mubr.f32.vlgmr.msra.gmra.mrb[14].mxu1 %v1233_v11 }
 0x568   :  { %2372 = vmatpush1.bf16.msra.mxu0 %v2813_v13  ;;  %2404 = vmatpush1.bf16.msra.mxu1 %v2835_v40 }
 0x569   :  { %2374 = vmatprep.subr.bf16.mxu0 %v2816_v19  ;;  %2406 = vmatprep.subr.bf16.mxu1 %v2841_v44 }
 0x56a   :  { %1487 = vmatprep.mubr.f32.mxu0 %v2740_v3  ;;  %1558 = vmatprep.mubr.f32.mxu1 %v2740_v3 }
 0x56c   :  { %2376 = vmatpush1.bf16.msra.mxu0 %v2823_v28  ;;  %2408 = vmatpush1.bf16.msra.mxu1 %v2849_v52 }
 0x56d   :  { %2378 = vmatprep.subr.bf16.mxu0 %v2829_v36  ;;  %2410 = vmatprep.subr.bf16.mxu1 %v2855_v56 }
 0x570   :  { %2380 = vmatpush1.bf16.msra.mxu0 %v2837_v41  ;;  %2412 = vmatpush1.bf16.msra.mxu1 %v2862_v0 }
 0x571   :  { %2382 = vmatprep.subr.bf16.mxu0 %v2843_v45  ;;  %2414 = vmatprep.subr.bf16.mxu1 %v2868_v6 }
 0x574   :  { %2384 = vmatpush1.bf16.msra.mxu0 %v2851_v53  ;;  %2416 = vmatpush1.bf16.msra.mxu1 %v2874_v16 }
 0x575   :  { %2386 = vmatprep.subr.bf16.mxu0 %v2857_v57  ;;  %2418 = vmatprep.subr.bf16.mxu1 %v2880_v21 }
 0x578   :  { %2388 = vmatpush1.bf16.msra.mxu0 %v2864_v1  ;;  %2420 = vmatpush1.bf16.msra.mxu1 %v2886_v30 }
 0x579   :  { %2390 = vmatprep.subr.bf16.mxu0 %v2870_v7  ;;  %2422 = vmatprep.subr.bf16.mxu1 %v2892_v34 }
 0x57c   :  { %2392 = vmatpush1.bf16.msra.mxu0 %v2876_v17  ;;  %2424 = vmatpush1.bf16.msra.mxu1 %v2898_v46 }
 0x57d   :  { %2394 = vmatprep.subr.bf16.mxu0 %v2882_v22  ;;  %2426 = vmatprep.subr.bf16.mxu1 %v2904_v48 }
 0x580   :  { %2396 = vmatpush1.bf16.msra.mxu0 %v2888_v31  ;;  %2428 = vmatpush1.bf16.msra.mxu1 %v2908_v55 }
 0x581   :  { %2398 = vmatprep.subr.bf16.mxu0 %v2894_v35  ;;  %2430 = vmatprep.subr.bf16.mxu1 %v2911_v58 }
 0x584   :  { %2400 = vmatpush1.bf16.msra.mxu0 %v2900_v47  ;;  %2432 = vmatpush1.bf16.msra.mxu1 %v2916_v61 }
 0x585   :  { %2434 = vmatprep.subr.bf16.mxu0 %v2808_v10  ;;  %2466 = vmatprep.subr.bf16.mxu1 %v2826_v32 }
 0x63a   :  { %v1301_v54 = vpop.f32.mrb[10].mxu0  ;;  %v1372_v12 = vpop.f32.mrb[14].mxu1 }
 0x63b   :  { %v1381_v14 = vrot.slane %v1301_v54, 3  ;;  %v1303_v18 = vpop.f32.mrb[11].mxu0  ;;  %v1374_v23 = vpop.f32.mrb[15].mxu1  ;;  %v1383_v37 = vrot.slane %v1372_v12, 3 }
 0x63c   :  { %v1382_v24 = vrot.slane %v1303_v18, 3  ;;  %v1384_v5 = vrot.slane %v1374_v23, 3 }
 0x63d   :  { %v1389_v25 = vadd.f32 %v1381_v14, %v2961_v15  ;;  %v1391_v10 = vadd.f32 %v1383_v37, %v2969_v38  ;;  %v1799_v37 = vld [vmem:[#allocation5 + $0x18] sm:$0xff] }
 0x63e   :  { %v1390_v27 = vadd.f32 %v1382_v24, %v2964_v20  ;;  %v1392_v32 = vadd.f32 %v1384_v5, %v2972_v50  ;;  %v1796_v24 = vld [vmem:[#allocation5] sm:$0xff] }
 0x63f   :  { %v1924_v29 = vmul.f32 -1.442695, %v1389_v25  ;;  %v1926_v42 = vmul.f32 -1.442695, %v1391_v10  ;;  %v1797_v25 = vld [vmem:[#allocation5 + $0x8] sm:$0xff]  ;;  %v1800_v10 = vld [vmem:[#allocation5 + $0x20] sm:$0xff] }
 0x640   :  { %v1925_v33 = vmul.f32 -1.442695, %v1390_v27  ;;  %v2498_v27 = vpack.c.bf16 %v1797_v25, %v1796_v24 }
 0x641   :  { %2613 = vpow2.f32 %v1924_v29  ;;  %v2741_v29 = vmov 0.0|0.0  }
 0x642   :  { %2615 = vpow2.f32 %v1925_v33  ;;  %v1798_v33 = vld [vmem:[#allocation5 + $0x10] sm:$0xff] }
 0x643   :  { %2617 = vtanh.f32 %v1392_v32  ;;  %v2501_v5 = vpack.c.bf16 %v1799_v37, %v1798_v33  ;;  %v1801_v32 = vld [vmem:[#allocation5 + $0x28] sm:$0xff] }
 0x644   :  { %2619 = vpow2.f32 %v1926_v42  ;;  %v2504_v42 = vpack.c.bf16 %v1801_v32, %v1800_v10 }
 0x64b   :  { %v2614_v43 = vpop.eup %2613 }
 0x64c   :  { %v1402_v49 = vadd.f32 1.0, %v2614_v43  ;;  %v2616_v51 = vpop.eup %2615  ;;  %v1802_v43 = vld [vmem:[#allocation5 + $0x30] sm:$0xff] }
 0x64d   :  { %v1403_v26 = vadd.f32 1.0, %v2616_v51  ;;  %v2618_v59 = vpop.eup %2617 }
 0x64e   :  { %2621 = vrcp.f32 %v1402_v49  ;;  %v2620_v60 = vpop.eup %2619  ;;  %v1803_v49 = vld [vmem:[#allocation5 + $0x38] sm:$0xff] }
 0x64f   :  { %2623 = vrcp.f32 %v1403_v26  ;;  %v1404_v8 = vadd.f32 1.0, %v2620_v60  ;;  %v2507_v51 = vpack.c.bf16 %v1803_v49, %v1802_v43  ;;  %v1804_v26 = vld [vmem:[#allocation5 + $0x40] sm:$0xff] }
 0x651   :  { %2625 = vrcp.f32 %v1404_v8  ;;  %v1809_v8 = vld [vmem:[#allocation5 + $0x68] sm:$0xff] }
 0x658   :  { %v2622_v62 = vpop.eup %2621 }
 0x659   :  { %v1416_v39 = vmul.f32 %v2622_v62, %v2618_v59  ;;  %v2624_v2 = vpop.eup %2623  ;;  %v1805_v59 = vld [vmem:[#allocation5 + $0x48] sm:$0xff]  ;;  %v1806_v62 = vld [vmem:[#allocation5 + $0x50] sm:$0xff] }
 0x65a   :  { %v1415_v9 = vmul.f32 %v2624_v2, %v1413_v4  ;;  %v2510_v60 = vpack.c.bf16 %v1805_v59, %v1804_v26  ;;  %v1807_v4 = vld [vmem:[#allocation5 + $0x58] sm:$0xff]  ;;  %v1808_v2 = vld [vmem:[#allocation5 + $0x60] sm:$0xff] }
 0x65b   :  { %v2626_v54 = vpop.eup %2625 }
 0x65c   :  { %v3185_v11 = vadd.f32 %v1416_v39, %v1415_v9  ;;  %v2513_v39 = vpack.c.bf16 %v1807_v4, %v1806_v62  ;;  %v2516_v9 = vpack.c.bf16 %v1809_v8, %v1808_v2 }
 0x65e   :  { %2627 = vtanh.f32 %v3185_v11 }
 0x668   :  { %v2628_v12 = vpop.eup %2627 }
 0x669   :  { %v1419_v14 = vmul.f32 %v2628_v12, %v2626_v54  ;;  %v1811_v54 = vld [vmem:[#allocation5 + $0x78] sm:$0xff] }
 0x66b   :  { %v1421_v18 = vrot.slane %v1419_v14, 5 }
 0x66d   :  { %1488 = vmatmul.mubr.f32.vlgmr.msra.gmra.mrb[12].mxu0 %v1421_v18  ;;  %1559 = vmatmul.mubr.f32.vlgmr.msra.gmra.mrb[16].mxu1 %v1421_v18 }
 0x66e   :  { %2436 = vmatpush1.bf16.msra.mxu0 %v2813_v13  ;;  %2468 = vmatpush1.bf16.msra.mxu1 %v2835_v40 }
 0x66f   :  { %2438 = vmatprep.subr.bf16.mxu0 %v2816_v19  ;;  %2470 = vmatprep.subr.bf16.mxu1 %v2841_v44 }
 0x670   :  { %1675 = vmatprep.mubr.f32.mxu0 %v2740_v3  ;;  %1746 = vmatprep.mubr.f32.mxu1 %v2740_v3 }
 0x672   :  { %2440 = vmatpush1.bf16.msra.mxu0 %v2823_v28  ;;  %2472 = vmatpush1.bf16.msra.mxu1 %v2849_v52 }
 0x673   :  { %2442 = vmatprep.subr.bf16.mxu0 %v2829_v36  ;;  %2474 = vmatprep.subr.bf16.mxu1 %v2855_v56 }
 0x676   :  { %2444 = vmatpush1.bf16.msra.mxu0 %v2837_v41  ;;  %2476 = vmatpush1.bf16.msra.mxu1 %v2862_v0 }
 0x677   :  { %2446 = vmatprep.subr.bf16.mxu0 %v2843_v45  ;;  %2478 = vmatprep.subr.bf16.mxu1 %v2868_v6 }
 0x67a   :  { %2448 = vmatpush1.bf16.msra.mxu0 %v2851_v53  ;;  %2480 = vmatpush1.bf16.msra.mxu1 %v2874_v16 }
 0x67b   :  { %2450 = vmatprep.subr.bf16.mxu0 %v2857_v57  ;;  %2482 = vmatprep.subr.bf16.mxu1 %v2880_v21 }
 0x67e   :  { %2452 = vmatpush1.bf16.msra.mxu0 %v2864_v1  ;;  %2484 = vmatpush1.bf16.msra.mxu1 %v2886_v30 }
 0x67f   :  { %2454 = vmatprep.subr.bf16.mxu0 %v2870_v7  ;;  %2486 = vmatprep.subr.bf16.mxu1 %v2892_v34  ;;  %v1601_v34 = vrot.slane %v3185_v11, 7  ;;  %v1810_v11 = vld [vmem:[#allocation5 + $0x70] sm:$0xff] }
 0x680   :  { %v2519_v12 = vpack.c.bf16 %v1811_v54, %v1810_v11 }
 0x682   :  { %2456 = vmatpush1.bf16.msra.mxu0 %v2876_v17  ;;  %2488 = vmatpush1.bf16.msra.mxu1 %v2898_v46 }
 0x683   :  { %2458 = vmatprep.subr.bf16.mxu0 %v2882_v22  ;;  %2490 = vmatprep.subr.bf16.mxu1 %v2904_v48 }
 0x686   :  { %2460 = vmatpush1.bf16.msra.mxu0 %v2888_v31  ;;  %2492 = vmatpush1.bf16.msra.mxu1 %v2908_v55 }
 0x687   :  { %2462 = vmatprep.subr.bf16.mxu0 %v2894_v35  ;;  %2494 = vmatprep.subr.bf16.mxu1 %v2911_v58 }
 0x68a   :  { %2464 = vmatpush1.bf16.msra.mxu0 %v2900_v47  ;;  %2496 = vmatpush1.bf16.msra.mxu1 %v2916_v61 }
 0x68b   :  { %2497 = vmatprep.subr.bf16.mxu0 %v2741_v29 }
 0x740   :  { %v1489_v13 = vpop.f32.mrb[12].mxu0  ;;  %v1560_v19 = vpop.f32.mrb[16].mxu1 }
 0x741   :  { %v1569_v28 = vrot.slane %v1489_v13, 2  ;;  %v1491_v36 = vpop.f32.mrb[13].mxu0  ;;  %v1562_v40 = vpop.f32.mrb[17].mxu1  ;;  %v1571_v56 = vrot.slane %v1560_v19, 2 }
 0x742   :  { %v1570_v41 = vrot.slane %v1491_v36, 2  ;;  %v1572_v57 = vrot.slane %v1562_v40, 2 }
 0x743   :  { %v1577_v44 = vadd.f32 %v1569_v28, %v2961_v15  ;;  %v1579_v0 = vadd.f32 %v1571_v56, %v2969_v38 }
 0x744   :  { %v1578_v45 = vadd.f32 %v1570_v41, %v2964_v20  ;;  %v1580_v1 = vadd.f32 %v1572_v57, %v2972_v50 }
 0x745   :  { %v1927_v52 = vmul.f32 -1.442695, %v1577_v44  ;;  %v1929_v6 = vmul.f32 -1.442695, %v1579_v0 }
 0x746   :  { %v1928_v53 = vmul.f32 -1.442695, %v1578_v45 }
 0x747   :  { %2629 = vpow2.f32 %v1927_v52 }
 0x748   :  { %2631 = vpow2.f32 %v1928_v53 }
 0x749   :  { %2633 = vtanh.f32 %v1580_v1 }
 0x74a   :  { %2635 = vpow2.f32 %v1929_v6 }
 0x751   :  { %v2630_v7 = vpop.eup %2629 }
 0x752   :  { %v1590_v16 = vadd.f32 1.0, %v2630_v7  ;;  %v2632_v17 = vpop.eup %2631 }
 0x753   :  { %v1591_v21 = vadd.f32 1.0, %v2632_v17  ;;  %v2634_v22 = vpop.eup %2633 }
 0x754   :  { %2637 = vrcp.f32 %v1590_v16  ;;  %v2636_v30 = vpop.eup %2635 }
 0x755   :  { %2639 = vrcp.f32 %v1591_v21  ;;  %v1592_v47 = vadd.f32 1.0, %v2636_v30 }
 0x757   :  { %2641 = vrcp.f32 %v1592_v47  ;;  %v1812_v47 = vld [vmem:[%s3254_s5] sm:$0x1] }
 0x75e   :  { %v2638_v31 = vpop.eup %2637 }
 0x75f   :  { %v1604_v35 = vmul.f32 %v2638_v31, %v2634_v22  ;;  %v2640_v46 = vpop.eup %2639 }
 0x760   :  { %v1603_v48 = vmul.f32 %v2640_v46, %v1601_v34 }
 0x761   :  { %v2642_v58 = vpop.eup %2641 }
 0x762   :  { %v3225_v55 = vadd.f32 %v1604_v35, %v1603_v48 }
 0x764   :  { %2643 = vtanh.f32 %v3225_v55  ;;  %v1789_v17 = vrot.slane %v3225_v55, 7 }
 0x76e   :  { %v2644_v61 = vpop.eup %2643 }
 0x76f   :  { %v1607_v63 = vmul.f32 %v2644_v61, %v2642_v58 }
 0x771   :  { %v1609_v23 = vrot.slane %v1607_v63, 6 }
 0x773   :  { %1676 = vmatmul.mubr.f32.vlgmr.msra.gmra.mrb[14].mxu0 %v1609_v23  ;;  %1747 = vmatmul.mubr.f32.vlgmr.msra.gmra.mrb[18].mxu1 %v1609_v23 }
 0x774   :  { %2499 = vmatpush3.bf16.msra.mxu0 %v2498_v27  ;;  %1982 = vmatprep.mubr.msk.f32.mxu0 %vm2742_vm2, %v2740_v3 }
 0x775   :  { %2500 = vmatprep.subr.bf16.mxu0 %v2741_v29 }
 0x778   :  { %2502 = vmatpush3.bf16.msra.mxu0 %v2501_v5 }
 0x779   :  { %2503 = vmatprep.subr.bf16.mxu0 %v2741_v29 }
 0x77c   :  { %2505 = vmatpush3.bf16.msra.mxu0 %v2504_v42 }
 0x77d   :  { %2506 = vmatprep.subr.bf16.mxu0 %v2741_v29 }
 0x780   :  { %2508 = vmatpush3.bf16.msra.mxu0 %v2507_v51 }
 0x781   :  { %2509 = vmatprep.subr.bf16.mxu0 %v2741_v29 }
 0x784   :  { %2511 = vmatpush3.bf16.msra.mxu0 %v2510_v60 }
 0x785   :  { %2512 = vmatprep.subr.bf16.mxu0 %v2741_v29 }
 0x788   :  { %2514 = vmatpush3.bf16.msra.mxu0 %v2513_v39 }
 0x789   :  { %2515 = vmatprep.subr.bf16.mxu0 %v2741_v29 }
 0x78c   :  { %2517 = vmatpush3.bf16.msra.mxu0 %v2516_v9 }
 0x78d   :  { %2518 = vmatprep.subr.bf16.mxu0 %v2741_v29 }
 0x790   :  { %2520 = vmatpush3.bf16.msra.mxu0 %v2519_v12 }
 0x846   :  { %v1677_v14 = vpop.f32.mrb[14].mxu0  ;;  %v1748_v18 = vpop.f32.mrb[18].mxu1 }
 0x847   :  { %v1757_v13 = vrot.slane %v1677_v14, 1  ;;  %v1679_v19 = vpop.f32.mrb[15].mxu0  ;;  %v1750_v28 = vpop.f32.mrb[19].mxu1  ;;  %v1759_v45 = vrot.slane %v1748_v18, 1 }
 0x848   :  { %v1758_v36 = vrot.slane %v1679_v19, 1  ;;  %v1760_v52 = vrot.slane %v1750_v28, 1 }
 0x849   :  { %v1765_v40 = vadd.f32 %v1757_v13, %v2961_v15  ;;  %v1767_v53 = vadd.f32 %v1759_v45, %v2969_v38 }
 0x84a   :  { %v1766_v41 = vadd.f32 %v1758_v36, %v2964_v20  ;;  %v1768_v56 = vadd.f32 %v1760_v52, %v2972_v50 }
 0x84b   :  { %v1930_v3 = vmul.f32 -1.442695, %v1765_v40  ;;  %v1932_v57 = vmul.f32 -1.442695, %v1767_v53 }
 0x84c   :  { %v1931_v44 = vmul.f32 -1.442695, %v1766_v41 }
 0x84d   :  { %2645 = vpow2.f32 %v1930_v3 }
 0x84e   :  { %2647 = vpow2.f32 %v1931_v44 }
 0x84f   :  { %2649 = vtanh.f32 %v1768_v56 }
 0x850   :  { %2651 = vpow2.f32 %v1932_v57 }
 0x857   :  { %v2646_v0 = vpop.eup %2645 }
 0x858   :  { %v1778_v1 = vadd.f32 1.0, %v2646_v0  ;;  %v2648_v6 = vpop.eup %2647 }
 0x859   :  { %v1779_v15 = vadd.f32 1.0, %v2648_v6  ;;  %v2650_v20 = vpop.eup %2649 }
 0x85a   :  { %2653 = vrcp.f32 %v1778_v1  ;;  %v2652_v7 = vpop.eup %2651 }
 0x85b   :  { %2655 = vrcp.f32 %v1779_v15  ;;  %v1780_v30 = vadd.f32 1.0, %v2652_v7 }
 0x85d   :  { %2657 = vrcp.f32 %v1780_v30 }
 0x864   :  { %v2654_v16 = vpop.eup %2653 }
 0x865   :  { %v1792_v21 = vmul.f32 %v2654_v16, %v2650_v20  ;;  %v2656_v22 = vpop.eup %2655 }
 0x866   :  { %v1791_v38 = vmul.f32 %v2656_v22, %v1789_v17 }
 0x867   :  { %v2658_v50 = vpop.eup %2657 }
 0x868   :  { %v1793_v31 = vadd.f32 %v1792_v21, %v1791_v38 }
 0x86a   :  { %2659 = vtanh.f32 %v1793_v31 }
 0x874   :  { %v2660_v34 = vpop.eup %2659 }
 0x875   :  { %v1795_v35 = vmul.f32 %v2660_v34, %v2658_v50 }
 0x877   :  { %v1814_v46 = vrot.slane %v1795_v35, 7 }
 0x879   :  { %1983 = vmatmul.mubr.f32.vlgmr.msra.gmra.mrb[16].mxu0 %v1814_v46 }
 0x94c   :  { %v1882_v48 = vpop.f32.mrb[16].mxu0 }
 0x94d   :  { %v1883_v55 = vadd.f32 %v1882_v48, %v1812_v47  ;;  %v1984_v58 = vpop.f32.mrb[17].mxu0 }
 0x94f   :  { %1886 = vst [vmem:[#allocation7] sm:$0x1] %v1883_v55 }
 0x950   :  { %2716 = shalt.err (!%p2713_p6)
}
 0x951   :  { %s2717_s10 = scalar_lea.hbm %s3255_s6, 16 }
 0x952   :  { %p2718_p7 = scmp.ne.s32.totalorder %s3255_s6, %s2717_s10  ;;  %p2721_p8 = scmp.lt.u32.totalorder %s2717_s10, %s3255_s6 }
 0x954   :  { %p2723_p9 = pnand %p2721_p8, %p2718_p7 }
 0x956   :  { %2726 = shalt.err (!%p2723_p9)
}
 0x957   :  { %1896 = dma.vmem_to_hbm [thread:$0]  %s1894_s29, 16, %s3255_s6, [#allocation4]  }
 0x958   :  { %2731 = dma.done.wait [#allocation4], 16  }
 0x959   :  { %2732 = vsyncadd [#allocation4], 4294967280 }
 0x95a   :  { %1900 = vsyncpa [#allocation3], 1 }
 0x95b   :  { %1901 = vsyncpa [#allocation6], 1 }
 0x95c   :  { %1902 = vsyncpa [#allocation4], 1 }

</bundles_post_ra>
